<compile_context>
chip_gen: v7x
topology: tpu7x:2x2x1
jax: 0.10.0
libtpu: 0.0.40
codegen_flags: <defaults>
</compile_context>

<pallas_src>
import math
import functools

import jax
import jax.numpy as jnp
from jax.experimental import pallas as pl
from jax.experimental.pallas import tpu as pltpu

# ----------------------------- synthetic ViT config -----------------------------
IMG = 16          # input spatial size
PATCH = 4         # patch size (== conv stride)
IN_CH = 3         # input channels (NCHW)
EMBED = 32        # embedding dim
HEADS = 2
HEAD_DIM = EMBED // HEADS
MLP_HIDDEN = EMBED * 4
NUM_BLOCKS = 4    # model_num_blocks (len(feature_info))
DEPTH = 4         # encoder depth
LN_EPS = 1e-6
HP = IMG // PATCH
NPATCH = HP * HP
SEQ = NPATCH + 1  # cls token + patches
NUM_PREFIX_TOKENS = 1

# kernel-side padded sizes (lane/sublane friendly)
SEQ_PAD = 24                     # 17 -> multiple of 8 sublanes
CPP = IN_CH * PATCH * PATCH      # 48
CPP_PAD = 128                    # lane-dense contraction dim for patch embed
ATTN_SCALE = 1.0 / math.sqrt(HEAD_DIM)
INV_SQRT2 = 1.0 / math.sqrt(2.0)


def sample_block_indices_uniformly(n, total_num_blocks):
    return [int(total_num_blocks / n * d) - 1 for d in range(1, n + 1)]


# ----------------------------- in-kernel math helpers -----------------------------
def _layernorm(x, w, b):
    mu = jnp.mean(x, axis=-1, keepdims=True)
    var = jnp.mean((x - mu) ** 2, axis=-1, keepdims=True)
    return (x - mu) * jax.lax.rsqrt(var + LN_EPS) * w + b


def _erf(x):
    # Abramowitz & Stegun 7.1.26 (|err| <= 1.5e-7): exact-GELU numerics to f32 tolerance
    # built from exp/mul/add only (EUP + VPU), no erf primitive required.
    p = 0.3275911
    a1, a2, a3, a4, a5 = 0.254829592, -0.284496736, 1.421413741, -1.453152027, 1.061405429
    sgn = jnp.where(x >= 0.0, 1.0, -1.0)
    ax = jnp.abs(x)
    t = 1.0 / (1.0 + p * ax)
    poly = ((((a5 * t + a4) * t + a3) * t + a2) * t + a1) * t
    return sgn * (1.0 - poly * jnp.exp(-ax * ax))


def _gelu_exact(x):
    # matches torch nn.GELU (exact / erf) to float32 tolerance
    return 0.5 * x * (1.0 + _erf(x * INV_SQRT2))


# ----------------------------- fused Pallas kernel -----------------------------
def fused_vit_kernel(
    xp_ref, pew_ref, tokinit_ref,
    ln1w_ref, ln1b_ref, qkvw_ref, qkvb_ref, projw_ref, projb_ref,
    ln2w_ref, ln2b_ref, fc1w_ref, fc1b_ref, fc2w_ref, fc2b_ref,
    out_ref, tok_ref,
):
    layer = pl.program_id(1)

    # --- layer 0: fused patch-embed matmul + cls/pos-embed, tokens -> resident VMEM ---
    @pl.when(layer == 0)
    def _():
        tok_ref[...] = (
            jnp.dot(xp_ref[0], pew_ref[...], preferred_element_type=jnp.float32)
            + tokinit_ref[...]                            # cls + pos + patch-embed bias
        )

    x = tok_ref[...]                                      # (SEQ_PAD, EMBED) f32

    # --- attention branch (pre-LN) ---
    h = _layernorm(x, ln1w_ref[0], ln1b_ref[0])
    qkv = (
        jnp.dot(h.astype(jnp.bfloat16), qkvw_ref[0], preferred_element_type=jnp.float32)
        + qkvb_ref[0]
    )                                                     # (SEQ_PAD, 3*EMBED) f32

    def split_heads(mat):                                 # (SEQ_PAD, EMBED) -> (HEADS, SEQ_PAD, HEAD_DIM)
        return jnp.stack(
            [mat[:, hh * HEAD_DIM:(hh + 1) * HEAD_DIM] for hh in range(HEADS)], axis=0
        ).astype(jnp.bfloat16)

    qh = split_heads(qkv[:, 0 * EMBED:1 * EMBED])
    kh = split_heads(qkv[:, 1 * EMBED:2 * EMBED])
    vh = split_heads(qkv[:, 2 * EMBED:3 * EMBED])

    # batched (over heads) score matmul on the MXU, f32 accumulation
    s = jnp.einsum("hqd,hkd->hqk", qh, kh, preferred_element_type=jnp.float32) * ATTN_SCALE
    # mask padded key tokens (indices >= SEQ) with an additive bias so padding never
    # leaks into real tokens
    kidx = jax.lax.broadcasted_iota(jnp.int32, (1, SEQ_PAD), 1)
    key_bias = jnp.where(kidx < SEQ, 0.0, -1e30)          # (1, SEQ_PAD)
    s = s + key_bias[None]                                # broadcast over (heads, queries)
    s = s - jnp.max(s, axis=-1, keepdims=True)
    p = jnp.exp(s)
    p = p * pl.reciprocal(jnp.sum(p, axis=-1, keepdims=True), approx=True)  # EUP, not VALU
    o = jnp.einsum("hqk,hkd->hqd", p.astype(jnp.bfloat16), vh,
                   preferred_element_type=jnp.float32)    # (HEADS, SEQ_PAD, HEAD_DIM)
    attn = jnp.concatenate([o[hh] for hh in range(HEADS)], axis=-1)          # (SEQ_PAD, EMBED)
    attn = (
        jnp.dot(attn.astype(jnp.bfloat16), projw_ref[0], preferred_element_type=jnp.float32)
        + projb_ref[0]
    )
    x = x + attn

    # --- MLP branch (pre-LN) ---
    h2 = _layernorm(x, ln2w_ref[0], ln2b_ref[0])
    h2 = (
        jnp.dot(h2.astype(jnp.bfloat16), fc1w_ref[0], preferred_element_type=jnp.float32)
        + fc1b_ref[0]
    )
    h2 = _gelu_exact(h2)                                  # exact GELU, matches torch default
    h2 = (
        jnp.dot(h2.astype(jnp.bfloat16), fc2w_ref[0], preferred_element_type=jnp.float32)
        + fc2b_ref[0]
    )
    x = x + h2

    tok_ref[...] = x            # carry tokens in VMEM to the next layer step
    out_ref[0, 0] = x           # per-layer intermediate for feature extraction


# ----------------------------- kernel wrapper -----------------------------
def _stack(blocks, name, dtype=None):
    arr = jnp.stack([blk[name] for blk in blocks], axis=0)
    return arr.astype(dtype) if dtype is not None else arr


def fused_vit_forward(params, x):
    """Patch-embed + all transformer blocks in one pallas_call.

    Returns all per-layer token tensors, shape (NUM_BLOCKS, B, SEQ_PAD, EMBED)."""
    B = x.shape[0]

    # patchify (glue): (B,C,H,W) -> (B, Np, C*P*P), then place at token rows 1..SEQ-1 of a
    # sublane-padded, lane-dense (contraction padded to 128) bf16 buffer.
    xp = x.reshape(B, IN_CH, HP, PATCH, HP, PATCH)
    xp = xp.transpose(0, 2, 4, 1, 3, 5).reshape(B, NPATCH, CPP)
    xp_pad = jnp.zeros((B, SEQ_PAD, CPP_PAD), jnp.bfloat16)
    xp_pad = xp_pad.at[:, NUM_PREFIX_TOKENS:SEQ, :CPP].set(xp.astype(jnp.bfloat16))

    # patch-embed weight, zero-padded along the contraction axis, bf16 for the MXU
    pe_w = jnp.zeros((CPP_PAD, EMBED), jnp.bfloat16)
    pe_w = pe_w.at[:CPP, :].set(params["pe_w"].astype(jnp.bfloat16))

    # token-init bias: row 0 = cls + pos[0]; rows 1..SEQ-1 = pos + patch-embed bias; pad rows = 0
    tok_init = jnp.zeros((SEQ_PAD, EMBED), jnp.float32)
    tok_init = tok_init.at[0, :].set(params["cls_token"][0, 0] + params["pos_embed"][0, 0])
    tok_init = tok_init.at[NUM_PREFIX_TOKENS:SEQ, :].set(
        params["pos_embed"][0, NUM_PREFIX_TOKENS:] + params["pe_b"][0])

    blocks = params["blocks"]
    stacked = [
        _stack(blocks, "ln1_w"), _stack(blocks, "ln1_b"),
        _stack(blocks, "qkv_w", jnp.bfloat16), _stack(blocks, "qkv_b"),
        _stack(blocks, "proj_w", jnp.bfloat16), _stack(blocks, "proj_b"),
        _stack(blocks, "ln2_w"), _stack(blocks, "ln2_b"),
        _stack(blocks, "fc1_w", jnp.bfloat16), _stack(blocks, "fc1_b"),
        _stack(blocks, "fc2_w", jnp.bfloat16), _stack(blocks, "fc2_b"),
    ]

    def resident(shape):           # same block every grid step -> fetched once
        nd = len(shape)
        return pl.BlockSpec(shape, lambda b, l, _nd=nd: (0,) * _nd)

    def per_layer(shape):          # stacked (L, ...) param: new block every layer step
        nd = len(shape)
        return pl.BlockSpec((1,) + tuple(shape[1:]),
                            lambda b, l, _nd=nd: (l,) + (0,) * (_nd - 1))

    in_specs = [
        pl.BlockSpec((1, SEQ_PAD, CPP_PAD), lambda b, l: (b, 0, 0)),  # per-batch patches
        resident((CPP_PAD, EMBED)),
        resident((SEQ_PAD, EMBED)),
    ] + [per_layer(p.shape) for p in stacked]

    out_spec = pl.BlockSpec((1, 1, SEQ_PAD, EMBED), lambda b, l: (l, b, 0, 0))

    return pl.pallas_call(
        fused_vit_kernel,
        grid=(B, NUM_BLOCKS),                              # layers innermost, batch parallel
        in_specs=in_specs,
        out_specs=out_spec,
        out_shape=jax.ShapeDtypeStruct((NUM_BLOCKS, B, SEQ_PAD, EMBED), jnp.float32),
        scratch_shapes=[pltpu.VMEM((SEQ_PAD, EMBED), jnp.float32)],   # resident tokens
        compiler_params=pltpu.CompilerParams(
            dimension_semantics=("parallel", "arbitrary")),
    )(xp_pad, pe_w, tok_init, *stacked)


# ----------------------------- parameter init -----------------------------
def init_params(key):
    keys = jax.random.split(key, 4 + NUM_BLOCKS)
    params = {}
    # patch-embed conv weight, stored pre-flattened in (C*P*P, D) matmul orientation
    # (equivalent to PyTorch Conv2d weight (D, C, P, P) flattened over (C,P,P) & transposed)
    params["pe_w"] = 0.02 * jax.random.normal(keys[0], (CPP, EMBED), jnp.float32)
    params["pe_b"] = jnp.zeros((1, EMBED), jnp.float32)
    params["cls_token"] = 1e-6 * jax.random.normal(keys[1], (1, 1, EMBED), jnp.float32)
    params["pos_embed"] = 0.02 * jax.random.normal(keys[2], (1, SEQ, EMBED), jnp.float32)

    blocks = []
    for i in range(NUM_BLOCKS):
        bk = jax.random.split(keys[4 + i], 4)
        # qkv_w is the (D, 3D) transpose of timm's (3D, D) Linear weight, columns [q|k|v]
        blocks.append(dict(
            ln1_w=jnp.ones((1, EMBED), jnp.float32),
            ln1_b=jnp.zeros((1, EMBED), jnp.float32),
            qkv_w=0.02 * jax.random.normal(bk[0], (EMBED, 3 * EMBED), jnp.float32),
            qkv_b=jnp.zeros((1, 3 * EMBED), jnp.float32),
            proj_w=0.02 * jax.random.normal(bk[1], (EMBED, EMBED), jnp.float32),
            proj_b=jnp.zeros((1, EMBED), jnp.float32),
            ln2_w=jnp.ones((1, EMBED), jnp.float32),
            ln2_b=jnp.zeros((1, EMBED), jnp.float32),
            fc1_w=0.02 * jax.random.normal(bk[2], (EMBED, MLP_HIDDEN), jnp.float32),
            fc1_b=jnp.zeros((1, MLP_HIDDEN), jnp.float32),
            fc2_w=0.02 * jax.random.normal(bk[3], (MLP_HIDDEN, EMBED), jnp.float32),
            fc2_b=jnp.zeros((1, EMBED), jnp.float32),
        ))
    params["blocks"] = blocks
    return params


# ----------------------------- encoder forward -----------------------------
@functools.partial(jax.jit, static_argnames=("output_indices",))
def timm_vit_encoder_forward(params, x, output_indices=None):
    """Mirrors TimmViTEncoder.forward: returns (features, prefix_tokens)."""
    if output_indices is None:
        output_indices = tuple(sample_block_indices_uniformly(DEPTH, NUM_BLOCKS))
    output_indices = tuple(i % NUM_BLOCKS for i in output_indices)  # normalize negatives

    B = x.shape[0]
    layer_outs = fused_vit_forward(params, x)   # (NUM_BLOCKS, B, SEQ_PAD, EMBED)

    features = []
    prefix_tokens = []
    for i in output_indices:
        out = layer_outs[i]
        spatial = out[:, NUM_PREFIX_TOKENS:SEQ, :].reshape(B, HP, HP, EMBED)
        features.append(spatial.transpose(0, 3, 1, 2))        # (B, D, Hp, Wp)  NCHW
        prefix_tokens.append(out[:, :NUM_PREFIX_TOKENS, :])   # (B, 1, D)
    return features, prefix_tokens


# ----------------------------- main -----------------------------
if __name__ == "__main__":
    key = jax.random.PRNGKey(0)
    pkey, xkey = jax.random.split(key)
    params = init_params(pkey)

    # input matches PyTorch convention: NCHW
    x = jax.random.normal(xkey, (2, IN_CH, IMG, IMG), jnp.float32)

    out_idx = tuple(sample_block_indices_uniformly(DEPTH, NUM_BLOCKS))
    features, prefix_tokens = timm_vit_encoder_forward(params, x, output_indices=out_idx)
    features = [jax.block_until_ready(f) for f in features]
    prefix_tokens = [jax.block_until_ready(p) for p in prefix_tokens]

    assert len(features) == DEPTH and len(prefix_tokens) == DEPTH
    for f, p in zip(features, prefix_tokens):
        assert f.shape == (2, EMBED, HP, HP), f.shape
        assert p.shape == (2, NUM_PREFIX_TOKENS, EMBED), p.shape
        assert bool(jnp.all(jnp.isfinite(f))) and bool(jnp.all(jnp.isfinite(p)))

    print("KERNEL_OK")
</pallas_src>

<mosaic_0001>
module attributes {stable_mosaic.version = 11 : i64} {
  func.func @fused_vit_kernel(%arg0: i32, %arg1: i32, %arg2: memref<1x24x128xbf16, #tpu.memory_space<vmem>>, %arg3: memref<128x32xbf16, #tpu.memory_space<vmem>>, %arg4: memref<24x32xf32, #tpu.memory_space<vmem>>, %arg5: memref<1x1x32xf32, #tpu.memory_space<vmem>>, %arg6: memref<1x1x32xf32, #tpu.memory_space<vmem>>, %arg7: memref<1x32x96xbf16, #tpu.memory_space<vmem>>, %arg8: memref<1x1x96xf32, #tpu.memory_space<vmem>>, %arg9: memref<1x32x32xbf16, #tpu.memory_space<vmem>>, %arg10: memref<1x1x32xf32, #tpu.memory_space<vmem>>, %arg11: memref<1x1x32xf32, #tpu.memory_space<vmem>>, %arg12: memref<1x1x32xf32, #tpu.memory_space<vmem>>, %arg13: memref<1x32x128xbf16, #tpu.memory_space<vmem>>, %arg14: memref<1x1x128xf32, #tpu.memory_space<vmem>>, %arg15: memref<1x128x32xbf16, #tpu.memory_space<vmem>>, %arg16: memref<1x1x32xf32, #tpu.memory_space<vmem>>, %arg17: memref<1x1x24x32xf32, #tpu.memory_space<vmem>>, %arg18: memref<24x32xf32, #tpu.memory_space<vmem>>) attributes {dimension_semantics = [#tpu.dimension_semantics<parallel>, #tpu.dimension_semantics<arbitrary>], iteration_bounds = array<i64: 2, 4>, scalar_prefetch = 0 : i64, scratch_operands = 1 : i64, tpu.core_type = #tpu.core_type<tc>, window_params = [{transform_indices = @transform_0, window_bounds = array<i64: 1, 24, 128>}, {pipeline_mode = #tpu.pipeline_mode<synchronous>, transform_indices = @transform_1, window_bounds = array<i64: 128, 32>}, {pipeline_mode = #tpu.pipeline_mode<synchronous>, transform_indices = @transform_2, window_bounds = array<i64: 24, 32>}, {transform_indices = @transform_3, window_bounds = array<i64: 1, 1, 32>}, {transform_indices = @transform_4, window_bounds = array<i64: 1, 1, 32>}, {transform_indices = @transform_5, window_bounds = array<i64: 1, 32, 96>}, {transform_indices = @transform_6, window_bounds = array<i64: 1, 1, 96>}, {transform_indices = @transform_7, window_bounds = array<i64: 1, 32, 32>}, {transform_indices = @transform_8, window_bounds = array<i64: 1, 1, 32>}, {transform_indices = @transform_9, window_bounds = array<i64: 1, 1, 32>}, {transform_indices = @transform_10, window_bounds = array<i64: 1, 1, 32>}, {transform_indices = @transform_11, window_bounds = array<i64: 1, 32, 128>}, {transform_indices = @transform_12, window_bounds = array<i64: 1, 1, 128>}, {transform_indices = @transform_13, window_bounds = array<i64: 1, 128, 32>}, {transform_indices = @transform_14, window_bounds = array<i64: 1, 1, 32>}, {transform_indices = @transform_15, window_bounds = array<i64: 1, 1, 24, 32>}]} {
    %c0_i32 = arith.constant 0 : i32
    %0 = arith.cmpi eq, %arg1, %c0_i32 : i32
    %1 = arith.extui %0 : i1 to i32
    %c0_i32_0 = arith.constant 0 : i32
    %2 = arith.cmpi ne, %1, %c0_i32_0 : i32
    scf.if %2 {
      %c0_80 = arith.constant 0 : index
      %c0_81 = arith.constant 0 : index
      %c0_82 = arith.constant 0 : index
      %185 = vector.load %arg2[%c0_80, %c0_81, %c0_82] : memref<1x24x128xbf16, #tpu.memory_space<vmem>>, vector<1x24x128xbf16>
      %186 = vector.shape_cast %185 : vector<1x24x128xbf16> to vector<24x128xbf16>
      %c0_83 = arith.constant 0 : index
      %c0_84 = arith.constant 0 : index
      %187 = vector.load %arg3[%c0_83, %c0_84] : memref<128x32xbf16, #tpu.memory_space<vmem>>, vector<128x32xbf16>
      %cst_85 = arith.constant dense<0.000000e+00> : vector<24x32xf32>
      %188 = tpu.matmul %186, %187, %cst_85 {dimension_numbers = #tpu.dot_dimension_numbers<[1], [0], [0], [1], [0, 0, 1, 1], [], []>} : vector<24x128xbf16>, vector<128x32xbf16>, vector<24x32xf32> -> vector<24x32xf32>
      %c0_86 = arith.constant 0 : index
      %c0_87 = arith.constant 0 : index
      %189 = vector.load %arg4[%c0_86, %c0_87] : memref<24x32xf32, #tpu.memory_space<vmem>>, vector<24x32xf32>
      %190 = arith.addf %188, %189 : vector<24x32xf32>
      %c0_88 = arith.constant 0 : index
      %c0_89 = arith.constant 0 : index
      %191 = vector.load %arg18[%c0_88, %c0_89] : memref<24x32xf32, #tpu.memory_space<vmem>>, vector<24x32xf32>
      tpu.vector_store %arg18[%c0_88, %c0_89], %190 {strides = array<i32>} : memref<24x32xf32, #tpu.memory_space<vmem>>, vector<24x32xf32>,
    } else {
    }
    %c0 = arith.constant 0 : index
    %c0_1 = arith.constant 0 : index
    %3 = vector.load %arg18[%c0, %c0_1] : memref<24x32xf32, #tpu.memory_space<vmem>>, vector<24x32xf32>
    %c0_2 = arith.constant 0 : index
    %c0_3 = arith.constant 0 : index
    %c0_4 = arith.constant 0 : index
    %4 = vector.load %arg5[%c0_2, %c0_3, %c0_4] : memref<1x1x32xf32, #tpu.memory_space<vmem>>, vector<1x1x32xf32>
    %5 = vector.shape_cast %4 : vector<1x1x32xf32> to vector<1x32xf32>
    %c0_5 = arith.constant 0 : index
    %c0_6 = arith.constant 0 : index
    %c0_7 = arith.constant 0 : index
    %6 = vector.load %arg6[%c0_5, %c0_6, %c0_7] : memref<1x1x32xf32, #tpu.memory_space<vmem>>, vector<1x1x32xf32>
    %7 = vector.shape_cast %6 : vector<1x1x32xf32> to vector<1x32xf32>
    %cst = arith.constant dense<0.000000e+00> : vector<24xf32>
    %8 = vector.multi_reduction <add>, %3, %cst [1] : vector<24x32xf32> to vector<24xf32>
    %9 = vector.shape_cast %8 : vector<24xf32> to vector<24x1xf32>
    %cst_8 = arith.constant 3.200000e+01 : f32
    %10 = vector.broadcast %cst_8 : f32 to vector<24x1xf32>
    %11 = arith.divf %9, %10 : vector<24x1xf32>
    %12 = vector.broadcast %11 : vector<24x1xf32> to vector<24x32xf32>
    %13 = arith.subf %3, %12 : vector<24x32xf32>
    %14 = arith.mulf %13, %13 : vector<24x32xf32>
    %cst_9 = arith.constant dense<0.000000e+00> : vector<24xf32>
    %15 = vector.multi_reduction <add>, %14, %cst_9 [1] : vector<24x32xf32> to vector<24xf32>
    %16 = vector.shape_cast %15 : vector<24xf32> to vector<24x1xf32>
    %cst_10 = arith.constant 3.200000e+01 : f32
    %17 = vector.broadcast %cst_10 : f32 to vector<24x1xf32>
    %18 = arith.divf %16, %17 : vector<24x1xf32>
    %19 = vector.broadcast %11 : vector<24x1xf32> to vector<24x32xf32>
    %20 = arith.subf %3, %19 : vector<24x32xf32>
    %cst_11 = arith.constant 9.99999997E-7 : f32
    %21 = vector.broadcast %cst_11 : f32 to vector<24x1xf32>
    %22 = arith.addf %18, %21 : vector<24x1xf32>
    %23 = math.rsqrt %22 : vector<24x1xf32>
    %24 = vector.broadcast %23 : vector<24x1xf32> to vector<24x32xf32>
    %25 = arith.mulf %20, %24 : vector<24x32xf32>
    %26 = vector.broadcast %5 : vector<1x32xf32> to vector<24x32xf32>
    %27 = arith.mulf %25, %26 : vector<24x32xf32>
    %28 = vector.broadcast %7 : vector<1x32xf32> to vector<24x32xf32>
    %29 = arith.addf %27, %28 : vector<24x32xf32>
    %30 = arith.truncf %29 : vector<24x32xf32> to vector<24x32xbf16>
    %c0_12 = arith.constant 0 : index
    %c0_13 = arith.constant 0 : index
    %c0_14 = arith.constant 0 : index
    %31 = vector.load %arg7[%c0_12, %c0_13, %c0_14] : memref<1x32x96xbf16, #tpu.memory_space<vmem>>, vector<1x32x96xbf16>
    %32 = vector.shape_cast %31 : vector<1x32x96xbf16> to vector<32x96xbf16>
    %cst_15 = arith.constant dense<0.000000e+00> : vector<24x96xf32>
    %33 = tpu.matmul %30, %32, %cst_15 {dimension_numbers = #tpu.dot_dimension_numbers<[1], [0], [0], [1], [0, 0, 1, 1], [], []>} : vector<24x32xbf16>, vector<32x96xbf16>, vector<24x96xf32> -> vector<24x96xf32>
    %c0_16 = arith.constant 0 : index
    %c0_17 = arith.constant 0 : index
    %c0_18 = arith.constant 0 : index
    %34 = vector.load %arg8[%c0_16, %c0_17, %c0_18] : memref<1x1x96xf32, #tpu.memory_space<vmem>>, vector<1x1x96xf32>
    %35 = vector.shape_cast %34 : vector<1x1x96xf32> to vector<1x96xf32>
    %36 = vector.broadcast %35 : vector<1x96xf32> to vector<24x96xf32>
    %37 = arith.addf %33, %36 : vector<24x96xf32>
    %38 = vector.extract_strided_slice %37 {offsets = [0, 0], sizes = [24, 32], strides = [1, 1]} : vector<24x96xf32> to vector<24x32xf32>
    %39 = vector.extract_strided_slice %38 {offsets = [0, 0], sizes = [24, 16], strides = [1, 1]} : vector<24x32xf32> to vector<24x16xf32>
    %40 = vector.extract_strided_slice %38 {offsets = [0, 16], sizes = [24, 16], strides = [1, 1]} : vector<24x32xf32> to vector<24x16xf32>
    %41 = vector.shape_cast %39 : vector<24x16xf32> to vector<1x24x16xf32>
    %42 = vector.shape_cast %40 : vector<24x16xf32> to vector<1x24x16xf32>
    %43 = tpu.concatenate %41, %42 in 0 : vector<1x24x16xf32>, vector<1x24x16xf32> -> vector<2x24x16xf32>
    %44 = arith.truncf %43 : vector<2x24x16xf32> to vector<2x24x16xbf16>
    %45 = vector.extract_strided_slice %37 {offsets = [0, 32], sizes = [24, 32], strides = [1, 1]} : vector<24x96xf32> to vector<24x32xf32>
    %46 = vector.extract_strided_slice %45 {offsets = [0, 0], sizes = [24, 16], strides = [1, 1]} : vector<24x32xf32> to vector<24x16xf32>
    %47 = vector.extract_strided_slice %45 {offsets = [0, 16], sizes = [24, 16], strides = [1, 1]} : vector<24x32xf32> to vector<24x16xf32>
    %48 = vector.shape_cast %46 : vector<24x16xf32> to vector<1x24x16xf32>
    %49 = vector.shape_cast %47 : vector<24x16xf32> to vector<1x24x16xf32>
    %50 = tpu.concatenate %48, %49 in 0 : vector<1x24x16xf32>, vector<1x24x16xf32> -> vector<2x24x16xf32>
    %51 = arith.truncf %50 : vector<2x24x16xf32> to vector<2x24x16xbf16>
    %52 = vector.extract_strided_slice %37 {offsets = [0, 64], sizes = [24, 32], strides = [1, 1]} : vector<24x96xf32> to vector<24x32xf32>
    %53 = vector.extract_strided_slice %52 {offsets = [0, 0], sizes = [24, 16], strides = [1, 1]} : vector<24x32xf32> to vector<24x16xf32>
    %54 = vector.extract_strided_slice %52 {offsets = [0, 16], sizes = [24, 16], strides = [1, 1]} : vector<24x32xf32> to vector<24x16xf32>
    %55 = vector.shape_cast %53 : vector<24x16xf32> to vector<1x24x16xf32>
    %56 = vector.shape_cast %54 : vector<24x16xf32> to vector<1x24x16xf32>
    %57 = tpu.concatenate %55, %56 in 0 : vector<1x24x16xf32>, vector<1x24x16xf32> -> vector<2x24x16xf32>
    %58 = arith.truncf %57 : vector<2x24x16xf32> to vector<2x24x16xbf16>
    "tpu.trace_start"() <{level = 10 : i32, message = "hqd,hkd->hqk"}> : () -> ()
    %cst_19 = arith.constant dense<0.000000e+00> : vector<2x24x24xf32>
    %59 = tpu.matmul %44, %51, %cst_19 {dimension_numbers = #tpu.dot_dimension_numbers<[2], [2], [1], [1], [0, 0, 0, 1, 1, 1], [0], [0]>} : vector<2x24x16xbf16>, vector<2x24x16xbf16>, vector<2x24x24xf32> -> vector<2x24x24xf32>
    "tpu.trace_stop"() : () -> ()
    %cst_20 = arith.constant 2.500000e-01 : f32
    %60 = vector.broadcast %cst_20 : f32 to vector<2x24x24xf32>
    %61 = arith.mulf %59, %60 : vector<2x24x24xf32>
    %62 = tpu.iota {dimensions = array<i32: 1>} : vector<1x24xi32>
    %c17_i32 = arith.constant 17 : i32
    %63 = vector.broadcast %c17_i32 : i32 to vector<1x24xi32>
    %64 = arith.cmpi slt, %62, %63 : vector<1x24xi32>
    %cst_21 = arith.constant 0.000000e+00 : f32
    %cst_22 = arith.constant -1.000000e+30 : f32
    %65 = vector.broadcast %cst_21 : f32 to vector<1x24xf32>
    %66 = vector.broadcast %cst_22 : f32 to vector<1x24xf32>
    %67 = arith.select %64, %65, %66 : vector<1x24xi1>, vector<1x24xf32>
    %68 = vector.shape_cast %67 : vector<1x24xf32> to vector<1x1x24xf32>
    %69 = vector.broadcast %68 : vector<1x1x24xf32> to vector<2x24x24xf32>
    %70 = arith.addf %61, %69 : vector<2x24x24xf32>
    %cst_23 = arith.constant dense<0xFF800000> : vector<2x24xf32>
    %71 = vector.multi_reduction <maximumf>, %70, %cst_23 [2] : vector<2x24x24xf32> to vector<2x24xf32>
    %72 = vector.shape_cast %71 : vector<2x24xf32> to vector<2x24x1xf32>
    %73 = vector.broadcast %72 : vector<2x24x1xf32> to vector<2x24x24xf32>
    %74 = arith.subf %70, %73 : vector<2x24x24xf32>
    %75 = math.exp %74 : vector<2x24x24xf32>
    %cst_24 = arith.constant dense<0.000000e+00> : vector<2x24xf32>
    %76 = vector.multi_reduction <add>, %75, %cst_24 [2] : vector<2x24x24xf32> to vector<2x24xf32>
    %77 = vector.shape_cast %76 : vector<2x24xf32> to vector<2x24x1xf32>
    %78 = tpu.reciprocal %77 {approx = true} : vector<2x24x1xf32> -> vector<2x24x1xf32>
    %79 = vector.broadcast %78 : vector<2x24x1xf32> to vector<2x24x24xf32>
    %80 = arith.mulf %75, %79 : vector<2x24x24xf32>
    %81 = arith.truncf %80 : vector<2x24x24xf32> to vector<2x24x24xbf16>
    "tpu.trace_start"() <{level = 10 : i32, message = "hqk,hkd->hqd"}> : () -> ()
    %cst_25 = arith.constant dense<0.000000e+00> : vector<2x24x16xf32>
    %82 = tpu.matmul %81, %58, %cst_25 {dimension_numbers = #tpu.dot_dimension_numbers<[2], [1], [1], [2], [0, 0, 0, 1, 1, 2], [0], [0]>} : vector<2x24x24xbf16>, vector<2x24x16xbf16>, vector<2x24x16xf32> -> vector<2x24x16xf32>
    "tpu.trace_stop"() : () -> ()
    %83 = vector.extract_strided_slice %82 {offsets = [0, 0, 0], sizes = [1, 24, 16], strides = [1, 1, 1]} : vector<2x24x16xf32> to vector<1x24x16xf32>
    %84 = vector.shape_cast %83 : vector<1x24x16xf32> to vector<24x16xf32>
    %85 = vector.extract_strided_slice %82 {offsets = [1, 0, 0], sizes = [1, 24, 16], strides = [1, 1, 1]} : vector<2x24x16xf32> to vector<1x24x16xf32>
    %86 = vector.shape_cast %85 : vector<1x24x16xf32> to vector<24x16xf32>
    %87 = tpu.concatenate %84, %86 in 1 : vector<24x16xf32>, vector<24x16xf32> -> vector<24x32xf32>
    %88 = arith.truncf %87 : vector<24x32xf32> to vector<24x32xbf16>
    %c0_26 = arith.constant 0 : index
    %c0_27 = arith.constant 0 : index
    %c0_28 = arith.constant 0 : index
    %89 = vector.load %arg9[%c0_26, %c0_27, %c0_28] : memref<1x32x32xbf16, #tpu.memory_space<vmem>>, vector<1x32x32xbf16>
    %90 = vector.shape_cast %89 : vector<1x32x32xbf16> to vector<32x32xbf16>
    %cst_29 = arith.constant dense<0.000000e+00> : vector<24x32xf32>
    %91 = tpu.matmul %88, %90, %cst_29 {dimension_numbers = #tpu.dot_dimension_numbers<[1], [0], [0], [1], [0, 0, 1, 1], [], []>} : vector<24x32xbf16>, vector<32x32xbf16>, vector<24x32xf32> -> vector<24x32xf32>
    %c0_30 = arith.constant 0 : index
    %c0_31 = arith.constant 0 : index
    %c0_32 = arith.constant 0 : index
    %92 = vector.load %arg10[%c0_30, %c0_31, %c0_32] : memref<1x1x32xf32, #tpu.memory_space<vmem>>, vector<1x1x32xf32>
    %93 = vector.shape_cast %92 : vector<1x1x32xf32> to vector<1x32xf32>
    %94 = vector.broadcast %93 : vector<1x32xf32> to vector<24x32xf32>
    %95 = arith.addf %91, %94 : vector<24x32xf32>
    %96 = arith.addf %3, %95 : vector<24x32xf32>
    %c0_33 = arith.constant 0 : index
    %c0_34 = arith.constant 0 : index
    %c0_35 = arith.constant 0 : index
    %97 = vector.load %arg11[%c0_33, %c0_34, %c0_35] : memref<1x1x32xf32, #tpu.memory_space<vmem>>, vector<1x1x32xf32>
    %98 = vector.shape_cast %97 : vector<1x1x32xf32> to vector<1x32xf32>
    %c0_36 = arith.constant 0 : index
    %c0_37 = arith.constant 0 : index
    %c0_38 = arith.constant 0 : index
    %99 = vector.load %arg12[%c0_36, %c0_37, %c0_38] : memref<1x1x32xf32, #tpu.memory_space<vmem>>, vector<1x1x32xf32>
    %100 = vector.shape_cast %99 : vector<1x1x32xf32> to vector<1x32xf32>
    %cst_39 = arith.constant dense<0.000000e+00> : vector<24xf32>
    %101 = vector.multi_reduction <add>, %96, %cst_39 [1] : vector<24x32xf32> to vector<24xf32>
    %102 = vector.shape_cast %101 : vector<24xf32> to vector<24x1xf32>
    %cst_40 = arith.constant 3.200000e+01 : f32
    %103 = vector.broadcast %cst_40 : f32 to vector<24x1xf32>
    %104 = arith.divf %102, %103 : vector<24x1xf32>
    %105 = vector.broadcast %104 : vector<24x1xf32> to vector<24x32xf32>
    %106 = arith.subf %96, %105 : vector<24x32xf32>
    %107 = arith.mulf %106, %106 : vector<24x32xf32>
    %cst_41 = arith.constant dense<0.000000e+00> : vector<24xf32>
    %108 = vector.multi_reduction <add>, %107, %cst_41 [1] : vector<24x32xf32> to vector<24xf32>
    %109 = vector.shape_cast %108 : vector<24xf32> to vector<24x1xf32>
    %cst_42 = arith.constant 3.200000e+01 : f32
    %110 = vector.broadcast %cst_42 : f32 to vector<24x1xf32>
    %111 = arith.divf %109, %110 : vector<24x1xf32>
    %112 = vector.broadcast %104 : vector<24x1xf32> to vector<24x32xf32>
    %113 = arith.subf %96, %112 : vector<24x32xf32>
    %cst_43 = arith.constant 9.99999997E-7 : f32
    %114 = vector.broadcast %cst_43 : f32 to vector<24x1xf32>
    %115 = arith.addf %111, %114 : vector<24x1xf32>
    %116 = math.rsqrt %115 : vector<24x1xf32>
    %117 = vector.broadcast %116 : vector<24x1xf32> to vector<24x32xf32>
    %118 = arith.mulf %113, %117 : vector<24x32xf32>
    %119 = vector.broadcast %98 : vector<1x32xf32> to vector<24x32xf32>
    %120 = arith.mulf %118, %119 : vector<24x32xf32>
    %121 = vector.broadcast %100 : vector<1x32xf32> to vector<24x32xf32>
    %122 = arith.addf %120, %121 : vector<24x32xf32>
    %123 = arith.truncf %122 : vector<24x32xf32> to vector<24x32xbf16>
    %c0_44 = arith.constant 0 : index
    %c0_45 = arith.constant 0 : index
    %c0_46 = arith.constant 0 : index
    %124 = vector.load %arg13[%c0_44, %c0_45, %c0_46] : memref<1x32x128xbf16, #tpu.memory_space<vmem>>, vector<1x32x128xbf16>
    %125 = vector.shape_cast %124 : vector<1x32x128xbf16> to vector<32x128xbf16>
    %cst_47 = arith.constant dense<0.000000e+00> : vector<24x128xf32>
    %126 = tpu.matmul %123, %125, %cst_47 {dimension_numbers = #tpu.dot_dimension_numbers<[1], [0], [0], [1], [0, 0, 1, 1], [], []>} : vector<24x32xbf16>, vector<32x128xbf16>, vector<24x128xf32> -> vector<24x128xf32>
    %c0_48 = arith.constant 0 : index
    %c0_49 = arith.constant 0 : index
    %c0_50 = arith.constant 0 : index
    %127 = vector.load %arg14[%c0_48, %c0_49, %c0_50] : memref<1x1x128xf32, #tpu.memory_space<vmem>>, vector<1x1x128xf32>
    %128 = vector.shape_cast %127 : vector<1x1x128xf32> to vector<1x128xf32>
    %129 = vector.broadcast %128 : vector<1x128xf32> to vector<24x128xf32>
    %130 = arith.addf %126, %129 : vector<24x128xf32>
    %cst_51 = arith.constant 5.000000e-01 : f32
    %131 = vector.broadcast %cst_51 : f32 to vector<24x128xf32>
    %132 = arith.mulf %131, %130 : vector<24x128xf32>
    %cst_52 = arith.constant 0.707106769 : f32
    %133 = vector.broadcast %cst_52 : f32 to vector<24x128xf32>
    %134 = arith.mulf %130, %133 : vector<24x128xf32>
    %cst_53 = arith.constant 0.000000e+00 : f32
    %135 = vector.broadcast %cst_53 : f32 to vector<24x128xf32>
    %136 = arith.cmpf oge, %134, %135 : vector<24x128xf32>
    %cst_54 = arith.constant 1.000000e+00 : f32
    %cst_55 = arith.constant -1.000000e+00 : f32
    %137 = vector.broadcast %cst_54 : f32 to vector<24x128xf32>
    %138 = vector.broadcast %cst_55 : f32 to vector<24x128xf32>
    %139 = arith.select %136, %137, %138 : vector<24x128xi1>, vector<24x128xf32>
    %140 = math.absf %134 : vector<24x128xf32>
    %cst_56 = arith.constant 0.327591091 : f32
    %141 = vector.broadcast %cst_56 : f32 to vector<24x128xf32>
    %142 = arith.mulf %141, %140 : vector<24x128xf32>
    %cst_57 = arith.constant 1.000000e+00 : f32
    %143 = vector.broadcast %cst_57 : f32 to vector<24x128xf32>
    %144 = arith.addf %143, %142 : vector<24x128xf32>
    %cst_58 = arith.constant 1.000000e+00 : f32
    %145 = vector.broadcast %cst_58 : f32 to vector<24x128xf32>
    %146 = arith.divf %145, %144 : vector<24x128xf32>
    %cst_59 = arith.constant 1.06140542 : f32
    %147 = vector.broadcast %cst_59 : f32 to vector<24x128xf32>
    %148 = arith.mulf %147, %146 : vector<24x128xf32>
    %cst_60 = arith.constant -1.45315206 : f32
    %149 = vector.broadcast %cst_60 : f32 to vector<24x128xf32>
    %150 = arith.addf %148, %149 : vector<24x128xf32>
    %151 = arith.mulf %150, %146 : vector<24x128xf32>
    %cst_61 = arith.constant 1.42141378 : f32
    %152 = vector.broadcast %cst_61 : f32 to vector<24x128xf32>
    %153 = arith.addf %151, %152 : vector<24x128xf32>
    %154 = arith.mulf %153, %146 : vector<24x128xf32>
    %cst_62 = arith.constant -0.284496725 : f32
    %155 = vector.broadcast %cst_62 : f32 to vector<24x128xf32>
    %156 = arith.addf %154, %155 : vector<24x128xf32>
    %157 = arith.mulf %156, %146 : vector<24x128xf32>
    %cst_63 = arith.constant 0.254829586 : f32
    %158 = vector.broadcast %cst_63 : f32 to vector<24x128xf32>
    %159 = arith.addf %157, %158 : vector<24x128xf32>
    %160 = arith.mulf %159, %146 : vector<24x128xf32>
    %cst_64 = arith.constant 0.000000e+00 : f32
    %161 = vector.broadcast %cst_64 : f32 to vector<24x128xf32>
    %162 = arith.subf %161, %140 : vector<24x128xf32>
    %163 = arith.mulf %162, %140 : vector<24x128xf32>
    %164 = math.exp %163 : vector<24x128xf32>
    %165 = arith.mulf %160, %164 : vector<24x128xf32>
    %cst_65 = arith.constant 1.000000e+00 : f32
    %166 = vector.broadcast %cst_65 : f32 to vector<24x128xf32>
    %167 = arith.subf %166, %165 : vector<24x128xf32>
    %168 = arith.mulf %139, %167 : vector<24x128xf32>
    %cst_66 = arith.constant 1.000000e+00 : f32
    %169 = vector.broadcast %cst_66 : f32 to vector<24x128xf32>
    %170 = arith.addf %169, %168 : vector<24x128xf32>
    %171 = arith.mulf %132, %170 : vector<24x128xf32>
    %172 = arith.truncf %171 : vector<24x128xf32> to vector<24x128xbf16>
    %c0_67 = arith.constant 0 : index
    %c0_68 = arith.constant 0 : index
    %c0_69 = arith.constant 0 : index
    %173 = vector.load %arg15[%c0_67, %c0_68, %c0_69] : memref<1x128x32xbf16, #tpu.memory_space<vmem>>, vector<1x128x32xbf16>
    %174 = vector.shape_cast %173 : vector<1x128x32xbf16> to vector<128x32xbf16>
    %cst_70 = arith.constant dense<0.000000e+00> : vector<24x32xf32>
    %175 = tpu.matmul %172, %174, %cst_70 {dimension_numbers = #tpu.dot_dimension_numbers<[1], [0], [0], [1], [0, 0, 1, 1], [], []>} : vector<24x128xbf16>, vector<128x32xbf16>, vector<24x32xf32> -> vector<24x32xf32>
    %c0_71 = arith.constant 0 : index
    %c0_72 = arith.constant 0 : index
    %c0_73 = arith.constant 0 : index
    %176 = vector.load %arg16[%c0_71, %c0_72, %c0_73] : memref<1x1x32xf32, #tpu.memory_space<vmem>>, vector<1x1x32xf32>
    %177 = vector.shape_cast %176 : vector<1x1x32xf32> to vector<1x32xf32>
    %178 = vector.broadcast %177 : vector<1x32xf32> to vector<24x32xf32>
    %179 = arith.addf %175, %178 : vector<24x32xf32>
    %180 = arith.addf %96, %179 : vector<24x32xf32>
    %c0_74 = arith.constant 0 : index
    %c0_75 = arith.constant 0 : index
    %181 = vector.load %arg18[%c0_74, %c0_75] : memref<24x32xf32, #tpu.memory_space<vmem>>, vector<24x32xf32>
    tpu.vector_store %arg18[%c0_74, %c0_75], %180 {strides = array<i32>} : memref<24x32xf32, #tpu.memory_space<vmem>>, vector<24x32xf32>,
    %c0_76 = arith.constant 0 : index
    %c0_77 = arith.constant 0 : index
    %c0_78 = arith.constant 0 : index
    %c0_79 = arith.constant 0 : index
    %182 = vector.load %arg17[%c0_76, %c0_77, %c0_78, %c0_79] : memref<1x1x24x32xf32, #tpu.memory_space<vmem>>, vector<1x1x24x32xf32>
    %183 = vector.shape_cast %182 : vector<1x1x24x32xf32> to vector<24x32xf32>
    %184 = vector.shape_cast %180 : vector<24x32xf32> to vector<1x1x24x32xf32>
    tpu.vector_store %arg17[%c0_76, %c0_77, %c0_78, %c0_79], %184 {strides = array<i32>} : memref<1x1x24x32xf32, #tpu.memory_space<vmem>>, vector<1x1x24x32xf32>,
    return
  }
  func.func @transform_0(%arg0: i32, %arg1: i32) -> (i32, i32, i32) {
    %c0_i32 = arith.constant 0 : i32
    %c0_i32_0 = arith.constant 0 : i32
    %c0_i32_1 = arith.constant 0 : i32
    return %arg0, %c0_i32, %c0_i32_0 : i32, i32, i32
  }
  func.func @transform_1(%arg0: i32, %arg1: i32) -> (i32, i32) {
    %c0_i32 = arith.constant 0 : i32
    %c0_i32_0 = arith.constant 0 : i32
    %c0_i32_1 = arith.constant 0 : i32
    return %c0_i32, %c0_i32_0 : i32, i32
  }
  func.func @transform_2(%arg0: i32, %arg1: i32) -> (i32, i32) {
    %c0_i32 = arith.constant 0 : i32
    %c0_i32_0 = arith.constant 0 : i32
    %c0_i32_1 = arith.constant 0 : i32
    return %c0_i32, %c0_i32_0 : i32, i32
  }
  func.func @transform_3(%arg0: i32, %arg1: i32) -> (i32, i32, i32) {
    %c0_i32 = arith.constant 0 : i32
    %c0_i32_0 = arith.constant 0 : i32
    %c0_i32_1 = arith.constant 0 : i32
    return %arg1, %c0_i32, %c0_i32_0 : i32, i32, i32
  }
  func.func @transform_4(%arg0: i32, %arg1: i32) -> (i32, i32, i32) {
    %c0_i32 = arith.constant 0 : i32
    %c0_i32_0 = arith.constant 0 : i32
    %c0_i32_1 = arith.constant 0 : i32
    return %arg1, %c0_i32, %c0_i32_0 : i32, i32, i32
  }
  func.func @transform_5(%arg0: i32, %arg1: i32) -> (i32, i32, i32) {
    %c0_i32 = arith.constant 0 : i32
    %c0_i32_0 = arith.constant 0 : i32
    %c0_i32_1 = arith.constant 0 : i32
    return %arg1, %c0_i32, %c0_i32_0 : i32, i32, i32
  }
  func.func @transform_6(%arg0: i32, %arg1: i32) -> (i32, i32, i32) {
    %c0_i32 = arith.constant 0 : i32
    %c0_i32_0 = arith.constant 0 : i32
    %c0_i32_1 = arith.constant 0 : i32
    return %arg1, %c0_i32, %c0_i32_0 : i32, i32, i32
  }
  func.func @transform_7(%arg0: i32, %arg1: i32) -> (i32, i32, i32) {
    %c0_i32 = arith.constant 0 : i32
    %c0_i32_0 = arith.constant 0 : i32
    %c0_i32_1 = arith.constant 0 : i32
    return %arg1, %c0_i32, %c0_i32_0 : i32, i32, i32
  }
  func.func @transform_8(%arg0: i32, %arg1: i32) -> (i32, i32, i32) {
    %c0_i32 = arith.constant 0 : i32
    %c0_i32_0 = arith.constant 0 : i32
    %c0_i32_1 = arith.constant 0 : i32
    return %arg1, %c0_i32, %c0_i32_0 : i32, i32, i32
  }
  func.func @transform_9(%arg0: i32, %arg1: i32) -> (i32, i32, i32) {
    %c0_i32 = arith.constant 0 : i32
    %c0_i32_0 = arith.constant 0 : i32
    %c0_i32_1 = arith.constant 0 : i32
    return %arg1, %c0_i32, %c0_i32_0 : i32, i32, i32
  }
  func.func @transform_10(%arg0: i32, %arg1: i32) -> (i32, i32, i32) {
    %c0_i32 = arith.constant 0 : i32
    %c0_i32_0 = arith.constant 0 : i32
    %c0_i32_1 = arith.constant 0 : i32
    return %arg1, %c0_i32, %c0_i32_0 : i32, i32, i32
  }
  func.func @transform_11(%arg0: i32, %arg1: i32) -> (i32, i32, i32) {
    %c0_i32 = arith.constant 0 : i32
    %c0_i32_0 = arith.constant 0 : i32
    %c0_i32_1 = arith.constant 0 : i32
    return %arg1, %c0_i32, %c0_i32_0 : i32, i32, i32
  }
  func.func @transform_12(%arg0: i32, %arg1: i32) -> (i32, i32, i32) {
    %c0_i32 = arith.constant 0 : i32
    %c0_i32_0 = arith.constant 0 : i32
    %c0_i32_1 = arith.constant 0 : i32
    return %arg1, %c0_i32, %c0_i32_0 : i32, i32, i32
  }
  func.func @transform_13(%arg0: i32, %arg1: i32) -> (i32, i32, i32) {
    %c0_i32 = arith.constant 0 : i32
    %c0_i32_0 = arith.constant 0 : i32
    %c0_i32_1 = arith.constant 0 : i32
    return %arg1, %c0_i32, %c0_i32_0 : i32, i32, i32
  }
  func.func @transform_14(%arg0: i32, %arg1: i32) -> (i32, i32, i32) {
    %c0_i32 = arith.constant 0 : i32
    %c0_i32_0 = arith.constant 0 : i32
    %c0_i32_1 = arith.constant 0 : i32
    return %arg1, %c0_i32, %c0_i32_0 : i32, i32, i32
  }
  func.func @transform_15(%arg0: i32, %arg1: i32) -> (i32, i32, i32, i32) {
    %c0_i32 = arith.constant 0 : i32
    %c0_i32_0 = arith.constant 0 : i32
    %c0_i32_1 = arith.constant 0 : i32
    return %arg1, %arg0, %c0_i32, %c0_i32_0 : i32, i32, i32, i32
  }
}

</mosaic_0001>

<bundles_post_ra>
// kernel: timm_vit_encoder_forward.1
= control target key start
LH: loop header
LB: loop body
LE: loop exit
PB: predicated region body
PF: predicated region fallthrough
CT: control target
= control target key end

     0   :  { %s2477_s18 = smov 0   ;;  %s2479_s19 = smov 0   ;;  %s2819_s0 = inlined_call_operand.vmem [shape: bf16[2,24,128], index: 0, kind: input, shape index: {}]   ;;  %s2820_s1 = inlined_call_operand.vmem [shape: bf16[128,32], index: 1, kind: input, shape index: {}]   ;;  %s2821_s2 = inlined_call_operand.vmem [shape: f32[24,32], index: 2, kind: input, shape index: {}]   ;;  %s2822_s3 = inlined_call_operand.vmem [shape: f32[4,1,32], index: 3, kind: input, shape index: {}]   ;;  %s2823_s4 = inlined_call_operand.vmem [shape: f32[4,1,32], index: 4, kind: input, shape index: {}]   ;;  %s2824_s5 = inlined_call_operand.vmem [shape: bf16[4,32,96], index: 5, kind: input, shape index: {}]   ;;  %s2825_s6 = inlined_call_operand.vmem [shape: f32[4,1,96], index: 6, kind: input, shape index: {}]   ;;  %s2826_s7 = inlined_call_operand.vmem [shape: bf16[4,32,32], index: 7, kind: input, shape index: {}]   ;;  %s2827_s8 = inlined_call_operand.vmem [shape: f32[4,1,32], index: 8, kind: input, shape index: {}]   ;;  %s2828_s9 = inlined_call_operand.vmem [shape: f32[4,1,32], index: 9, kind: input, shape index: {}]   ;;  %s2829_s10 = inlined_call_operand.vmem [shape: f32[4,1,32], index: 10, kind: input, shape index: {}]   ;;  %s2830_s11 = inlined_call_operand.vmem [shape: bf16[4,32,128], index: 11, kind: input, shape index: {}]   ;;  %s2831_s12 = inlined_call_operand.vmem [shape: f32[4,1,128], index: 12, kind: input, shape index: {}]   ;;  %s2832_s13 = inlined_call_operand.vmem [shape: bf16[4,128,32], index: 13, kind: input, shape index: {}]   ;;  %s2833_s14 = inlined_call_operand.vmem [shape: f32[4,1,32], index: 14, kind: input, shape index: {}]   ;;  %s2834_s15 = inlined_call_operand.vmem [shape: f32[4,2,24,32], index: 15, kind: output, shape index: {}]  }
   0x1   :  { %2841 = sst [smem:[#allocation9_spill]] %s2819_s0  ;;  %s2481_s20 = smov 0  }
   0x2   :  { %2842 = sst [smem:[#allocation10_spill]] %s2820_s1  ;;  %s2483_s21 = smov 0  }
   0x3   :  { %2843 = sst [smem:[#allocation11_spill]] %s2821_s2  ;;  %s2485_s22 = smov 0  }
   0x4   :  { %2844 = sst [smem:[#allocation12_spill]] %s2823_s4 }
   0x5   :  { %2845 = sst [smem:[#allocation13_spill]] %s2824_s5 }
   0x6   :  { %2846 = sst [smem:[#allocation14_spill]] %s2826_s7 }
   0x7   :  { %2847 = sst [smem:[#allocation15_spill]] %s2829_s10 }
   0x8   :  { %2848 = sst [smem:[#allocation16_spill]] %s2830_s11 }
   0x9   :  { %2849 = sst [smem:[#allocation17_spill]] %s2834_s15 }
   0xa LB: > { %2850 = sst [smem:[#allocation3_spill]] %s2373_s18  ;;  %s34_s23 = sadd.s32 1, %s2381_s20  ;;  %s2389_s22 = sphi %s2485_s22, %s25_s22   ;;  %s2385_s21 = sphi %s2483_s21, %s2878_s21   ;;  %s2381_s20 = sphi %s2481_s20, %s2877_s20   ;;  %s2377_s19 = sphi %s2479_s19, %s2876_s19   ;;  %s2373_s18 = sphi %s2477_s18, %s2875_s18  }
   0xb   : > { %2851 = sst [smem:[#allocation4_spill]] %s2381_s20  ;;  %s37_s24 = sadd.s32 1, %s2385_s21 }
   0xc   : > { %2852 = sst [smem:[#allocation5_spill]] %s2385_s21  ;;  %p35_p0 = scmp.ge.s32.totalorder %s34_s23, 4 }
   0xd   : > { %2853 = sst [smem:[#allocation6_spill]] %s2389_s22  ;;  %p2006_p1 = scmp.ge.s32.totalorder %s2389_s22, 1 }
   0xe   : > { %p555_p2 = scmp.lt.s32.totalorder %s2389_s22, 9  ;;  %s2880_s23 = smov (%p35_p0, %s34_s23), 0 }
   0xf   : > { %2854 = sst [smem:[#allocation7_spill]] %s2880_s23  ;;  %s2882_s24 = smov (!%p35_p0, %s37_s24), %s2385_s21 }
  0x10   : > { %p556_p3 = pnand %p2006_p1, %p555_p2  ;;  %p39_p4 = scmp.ge.s32.totalorder %s2882_s24, 2 }
  0x11   : > { %p651_p5 = scmp.lt.s32.totalorder (!%p556_p3), %s2377_s19, 1  ;;  %p656_p6 = scmp.lt.s32.totalorder (!%p556_p3), %s2373_s18, 3 }
  0x12   : > { %s2884_s24 = smov (%p39_p4, %s2882_s24), 0  ;;  %559 = sbr.rel (%p556_p3) target bundleno = 2992 (0xbb0), region = 80 }
  0x13   : > { %2855 = sst [smem:[#allocation8_spill]] %s2884_s24  ;;  %s2857_s0 = sld [smem:[#allocation9_spill]] (!%p556_p3) }
  0x14   : > { %s2858_s5 = sld [smem:[#allocation13_spill]] (!%p556_p3)  ;;  %s2859_s7 = sld [smem:[#allocation14_spill]] (!%p556_p3) }
  0x15   : > { %s2861_s11 = sld [smem:[#allocation16_spill]] (!%p556_p3)  ;;  %s2863_s29 = sld [smem:[#allocation3_spill]] (!%p556_p3) }
  0x19   : > { %s2886_s19 = smov (!%p651_p5, %s2377_s19), 1 }
  0x1a   : > { %s2511_s25 = scalar_select %p656_p6, %s2373_s18, 3 }
  0x1b   : > { %s2220_s26 = smul.u32 12, %s2886_s19  ;;  %p2017_p7 = scmp.ne.s32.totalorder %s2863_s29, 0 }
  0x1c   : > { %s2066_s20 = sshll.u32 %s2511_s25, 4  ;;  %s691_s27 = scalar_lea.vmem %s2831_s12, %s2511_s25  ;;  %vm842_vm0 = vcmask (!%p2017_p7), 261120  }
  0x1d   : > { %s2524_s21 = scalar_lea.vmem %s2857_s0, %s2220_s26  ;;  %s2530_s1 = scalar_lea.vmem %s2858_s5, %s2066_s20 }
  0x1e   : > { %s2539_s30 = scalar_lea.vmem %s2859_s7, %s2066_s20  ;;  %s2556_s18 = scalar_lea.vmem %s2861_s11, %s2066_s20  ;;  %v2277_v4 = vld [vmem:[%s2524_s21] sm:$0xff] (!%p2017_p7)   ;;  %v2278_v9 = vld [vmem:[%s2524_s21 + $0x8] ss:$0 sps:$4 sm:$0xff] (!%p2017_p7)  }
  0x1f   : > { %s2069_s7 = sshll.u32 %s2511_s25, 6  ;;  %s699_s23 = scalar_lea.vmem %s2833_s14, %s2511_s25  ;;  %2134 = vmatprep.mubr.bf16.mxu0 (!%p2017_p7), %v2277_v4 }
  0x20   : > { %s2570_s0 = scalar_lea.vmem %s2832_s13, %s2069_s7  ;;  %s2221_s2 = smul.u32 3, %s2886_s19 }
  0x21   : > { %s2222_s22 = smul.u32 6, %s2511_s25  ;;  %s2862_s11 = sld [smem:[#allocation17_spill]] }
  0x22   : > { %713 = sbr.rel (%p2017_p7) target bundleno = 291 (0x123), region = 84  ;;  %s2864_s16 = sld [smem:[#allocation10_spill]] (!%p2017_p7) }
  0x23   : > { %s706_s5 = sadd.s32 %s2222_s22, %s2221_s2 }
  0x24   : > { %s2016_s4 = sshll.u32 %s706_s5, 3  ;;  %s2865_s5 = sld [smem:[#allocation11_spill]] (!%p2017_p7) }
  0x27   : > { %s2576_s10 = scalar_lea.vmem %s2862_s11, %s2016_s4 }
  0x28   : > { %v2269_v0 = vld [vmem:[%s2864_s16] sm:$0xff] (!%p2017_p7)   ;;  %v2270_v1 = vld [vmem:[%s2864_s16 + $0x8] sm:$0xff] (!%p2017_p7)   ;;  %v2271_v2 = vld [vmem:[%s2864_s16 + $0x10] sm:$0xff] (!%p2017_p7)  }
  0x29   : > { %2118 = vmatprep.subr.bf16.mxu0 %v2269_v0  ;;  %v2272_v3 = vld [vmem:[%s2864_s16 + $0x18] sm:$0xff]   ;;  %v2273_v5 = vld [vmem:[%s2864_s16 + $0x20] sm:$0xff]   ;;  %v2274_v6 = vld [vmem:[%s2864_s16 + $0x28] sm:$0xff]  }
  0x2a   : > { %2119 = vmatpush3.bf16.msra.mxu0 %v2269_v0  ;;  %v2275_v7 = vld [vmem:[%s2864_s16 + $0x30] sm:$0xff]   ;;  %v2276_v8 = vld [vmem:[%s2864_s16 + $0x38] sm:$0xff]   ;;  %v733_v11 = vld [vmem:[%s2865_s5] sm:$0xff] }
  0x2b   : > { %2120 = vmatprep.subr.bf16.mxu0 %v2270_v1  ;;  %v735_v10 = vld [vmem:[%s2865_s5 + $0x10] sm:$0xff]  ;;  %v734_v15 = vld [vmem:[%s2865_s5 + $0x8] sm:$0xff] }
  0x2e   : > { %2121 = vmatpush3.bf16.msra.mxu0 %v2270_v1 }
  0x2f   : > { %2122 = vmatprep.subr.bf16.mxu0 %v2271_v2 }
  0x32   : > { %2123 = vmatpush3.bf16.msra.mxu0 %v2271_v2 }
  0x33   : > { %2124 = vmatprep.subr.bf16.mxu0 %v2272_v3 }
  0x36   : > { %2125 = vmatpush3.bf16.msra.mxu0 %v2272_v3 }
  0x37   : > { %2126 = vmatprep.subr.bf16.mxu0 %v2273_v5 }
  0x3a   : > { %2127 = vmatpush3.bf16.msra.mxu0 %v2273_v5 }
  0x3b   : > { %2128 = vmatprep.subr.bf16.mxu0 %v2274_v6 }
  0x3e   : > { %2129 = vmatpush3.bf16.msra.mxu0 %v2274_v6 }
  0x3f   : > { %2130 = vmatprep.subr.bf16.mxu0 %v2275_v7 }
  0x42   : > { %2131 = vmatpush3.bf16.msra.mxu0 %v2275_v7 }
  0x43   : > { %2132 = vmatprep.subr.bf16.mxu0 %v2276_v8 }
  0x46   : > { %2133 = vmatpush3.bf16.msra.mxu0 %v2276_v8 }
  0x49   : > { %2135 = vmatmul.mubr.bf16.vlgmr.msra.gmra.mrb[0].mxu0 %v2278_v9 }
 0x11c   : > { %v2136_v12 = vpop.f32.mrb[0].mxu0 }
 0x11d   : > { %v837_v13 = vadd.f32 %v2136_v12, %v735_v10  ;;  %v828_v14 = vpop.f32.mrb[1].mxu0 }
 0x11e   : > { %v829_v16 = vadd.f32 %v828_v14, %v733_v11  ;;  %v2137_v17 = vpop.f32.mrb[2].mxu0 }
 0x11f   : > { %845 = vst.msk [vmem:[#allocation2 + $0x10] sm:$0xff] %vm842_vm0, %v837_v13  ;;  %v831_v18 = vpop.f32.mrb[3].mxu0 }
 0x120   : > { %843 = vst.msk [vmem:[#allocation2] sm:$0xff] %vm842_vm0, %v829_v16  ;;  %v832_v19 = vadd.f32 %v831_v18, %v734_v15 }
 0x122   : > { %844 = vst.msk [vmem:[#allocation2 + $0x8] sm:$0xff] %vm842_vm0, %v832_v19 }
 0x123 PF: > { %vm851_vm1 = vcmask 261120   ;;  %v2289_v41 = vld [vmem:[%s2530_s1] sm:$0xff]   ;;  %v2290_v42 = vld [vmem:[%s2530_s1 + $0x8] sm:$0xff]   ;;  %s2866_s22 = scalar_lea.vmem %s2822_s3, %s2511_s25  ;;  %s2867_s15 = sld [smem:[#allocation12_spill]]  ;;  %vm1011_vm2 = vcmask 130048   ;;  %vm1154_vm4 = vcmask 195584  }
 0x124   : > { %2138 = vmatprep.subr.bf16.mxu0 %v2289_v41  ;;  %v2028_v54 = vld [vmem:[%s2866_s22] ss:$0 sm:$0xff]  ;;  %s2869_s24 = scalar_lea.vmem %s2825_s6, %s2511_s25  ;;  %s2391_s7 = smov 112   ;;  %vm1236_vm5 = vcmask 1043456  }
 0x125   : > { %2139 = vmatpush3.bf16.msra.mxu0 %v2289_v41  ;;  %v2030_v4 = vld [vmem:[%s2869_s24] ss:$0 sm:$0xff]  ;;  %s2392_s19 = smov 96   ;;  %s2394_s11 = smov 64  }
 0x126   : > { %v2616_v21 = vld [vmem:[#allocation2 + $0x10] sm:$0xff]  ;;  %2140 = vmatprep.subr.bf16.mxu0 %v2290_v42  ;;  %s2395_s26 = smov 16   ;;  %s2870_s1 = scalar_lea.vmem %s2827_s8, %s2511_s25 }
 0x127   : > { %v2614_v20 = vld [vmem:[#allocation2] sm:$0xff]  ;;  %v858_v24 = vsel %vm851_vm1, %v2616_v21, 0.0  ;;  %s2871_s22 = scalar_lea.vmem %s2828_s9, %s2511_s25 }
 0x128   : > { %v852_v23 = vsel %vm851_vm1, %v2614_v20, 0.0  ;;  %859 = vadd.xlane.f32.xlu1 %v858_v24 }
 0x129   : > { %v2618_v22 = vld [vmem:[#allocation2 + $0x8] sm:$0xff]  ;;  %853 = vadd.xlane.f32.xlu0 %v852_v23  ;;  %2141 = vmatpush3.bf16.msra.mxu0 %v2290_v42  ;;  %s2868_s29 = scalar_lea.vmem %s2867_s15, %s2511_s25  ;;  %s2872_s15 = sld [smem:[#allocation15_spill]] }
 0x12a   : > { %v855_v25 = vsel %vm851_vm1, %v2618_v22, 0.0  ;;  %v2029_v60 = vld [vmem:[%s2868_s29] ss:$0 sm:$0xff] }
 0x12d   : > { %856 = vadd.xlane.f32.xlu0 %v855_v25 }
 0x12f   : > { %s2873_s29 = scalar_lea.vmem %s2872_s15, %s2511_s25 }
 0x1b5   : > { %v860_v27 = vpop.xlane.xlu1 %859 }
 0x1b6   : > { %v854_v26 = vpop.xlane.xlu0 %853  ;;  %v864_v29 = vmul.f32 0.03125, %v860_v27 }
 0x1b7   : > { %v862_v28 = vmul.f32 0.03125, %v854_v26 }
 0x1b8   : > { %v867_v31 = vsub.f32 %v2616_v21, %v864_v29 }
 0x1b9   : > { %v865_v30 = vsub.f32 %v2614_v20, %v862_v28 }
 0x1ba   : > { %v857_v32 = vpop.xlane.xlu0 %856  ;;  %v870_v35 = vmul.f32 %v867_v31, %v867_v31 }
 0x1bb   : > { %v863_v33 = vmul.f32 0.03125, %v857_v32  ;;  %v868_v34 = vmul.f32 %v865_v30, %v865_v30 }
 0x1bc   : > { %v877_v38 = vsel %vm851_vm1, %v870_v35, 0.0 }
 0x1bd   : > { %v866_v36 = vsub.f32 %v2618_v22, %v863_v33  ;;  %v871_v37 = vsel %vm851_vm1, %v868_v34, 0.0 }
 0x1be   : > { %872 = vadd.xlane.f32.xlu1 %v871_v37 }
 0x1bf   : > { %v869_v39 = vmul.f32 %v866_v36, %v866_v36 }
 0x1c1   : > { %v874_v40 = vsel %vm851_vm1, %v869_v39, 0.0 }
 0x1c2   : > { %878 = vadd.xlane.f32.xlu1 %v877_v38  ;;  %875 = vadd.xlane.f32.xlu0 %v874_v40 }
 0x24b   : > { %v873_v43 = vpop.xlane.xlu1 %872 }
 0x24c   : > { %v880_v44 = vmul.f32 0.03125, %v873_v43 }
 0x24e   : > { %v883_v45 = vadd.f32 1e-06, %v880_v44  ;;  %v2393_v44 = vmov -1e+30  }
 0x24f   : > { %v879_v46 = vpop.xlane.xlu1 %878  ;;  %v876_v47 = vpop.xlane.xlu0 %875 }
 0x250   : > { %2303 = vrsqrt.f32 %v883_v45  ;;  %v882_v48 = vmul.f32 0.03125, %v879_v46  ;;  %v881_v49 = vmul.f32 0.03125, %v876_v47 }
 0x252   : > { %v885_v50 = vadd.f32 1e-06, %v882_v48  ;;  %v884_v51 = vadd.f32 1e-06, %v881_v49 }
 0x254   : > { %2305 = vrsqrt.f32 %v885_v50 }
 0x255   : > { %2307 = vrsqrt.f32 %v884_v51 }
 0x25a   : > { %v2304_v52 = vpop.eup %2303 }
 0x25b   : > { %v889_v53 = vmul.f32 %v2304_v52, %v865_v30 }
 0x25d   : > { %v898_v59 = vmul.f32 %v2028_v54, %v889_v53 }
 0x25e   : > { %v2306_v55 = vpop.eup %2305 }
 0x25f   : > { %v2308_v56 = vpop.eup %2307  ;;  %v891_v57 = vmul.f32 %v2306_v55, %v867_v31  ;;  %v907_v0 = vadd.f32 %v2029_v60, %v898_v59 }
 0x260   : > { %v890_v58 = vmul.f32 %v2308_v56, %v866_v36  ;;  %v1144_v36 = vlaneseq }
 0x261   : > { %v900_v61 = vmul.f32 %v2028_v54, %v891_v57 }
 0x262   : > { %v899_v62 = vmul.f32 %v2028_v54, %v890_v58  ;;  %v1145_v37 = vand.u32 127, %v1144_v36 }
 0x263   : > { %v909_v63 = vadd.f32 %v2029_v60, %v900_v61 }
 0x264   : > { %v908_v1 = vadd.f32 %v2029_v60, %v899_v62  ;;  %vm1146_vm3 = vcmp.lt.s32.totalorder %v1145_v37, 17 }
 0x265   : > { %v911_v2 = vpack.c.bf16 %v909_v63, %v909_v63  ;;  %v1147_v45 = vsel %vm1146_vm3, 0.0, %v2393_v44 }
 0x266   : > { %v910_v3 = vpack.c.bf16 %v908_v1, %v907_v0 }
 0x268   : > { %2142 = vmatprep.mubr.msk.bf16.mxu0 %vm851_vm1, %v910_v3 }
 0x269   : > { %2143 = vmatmul.mubr.msk.bf16.vlgmr.msra.gmra.mrb[0].mxu0 %vm851_vm1, %v911_v2 }
 0x33c   : > { %v2144_v5 = vpop.f32.mrb[0].mxu0 }
 0x33d   : > { %v984_v6 = vadd.f32 %v2144_v5, %v2030_v4  ;;  %v975_v7 = vpop.f32.mrb[1].mxu0 }
 0x33e   : > { %v2145_v8 = vpop.f32.mrb[2].mxu0  ;;  %v976_v10 = vadd.f32 %v2030_v4, %v975_v7 }
 0x33f   : > { %996 = vrot.lane.b32.xlu1 %v984_v6, %s2391_s7  ;;  %v978_v9 = vpop.f32.mrb[3].mxu0  ;;  %v2656_v14 = vpack.c.bf16 %v984_v6, %v984_v6 }
 0x340   : > { %v979_v11 = vadd.f32 %v2030_v4, %v978_v9 }
 0x342   : > { %v2279_v12 = vpack.i.bf16 %v979_v11, %v976_v10  ;;  %v2651_v13 = vpack.c.bf16 %v979_v11, %v976_v10 }
 0x344   : > { %2280 = vrot.lane.b32.xlu0 %v2279_v12, %s2391_s7  ;;  %1007 = vrot.lane.b32.xlu1 %v2651_v13, %s2392_s19 }
 0x345   : > { %2150 = vmatprep.mubr.msk.bf16.mxu0 %vm1011_vm2, %v2651_v13 }
 0x348   : > { %1009 = vrot.lane.b32.xlu1 %v2656_v14, %s2392_s19 }
 0x3b1   : > { %v997_v15 = vpop.permute.xlu1 %996 }
 0x3b2   : > { %v2659_v16 = vpack.c.bf16 %v997_v15, %v997_v15 }
 0x3b4   : > { %1076 = vrot.lane.b32.xlu1 %v2659_v16, %s2392_s19 }
 0x3b6   : > { %v2281_v17 = vpop.permute.xlu0 %2280  ;;  %v1008_v18 = vpop.permute.xlu1 %1007 }
 0x3b7   : > { %v2283_v19 = vunpack.i.h.bf16 %v2281_v17  ;;  %v2282_v23 = vunpack.i.l.bf16 %v2281_v17  ;;  %v1019_v24 = vsel %vm1011_vm2, %v1008_v18, 0  ;;  %2214 = vmatprep.subr.msk.bf16.mxu0 %vm1011_vm2, %v1008_v18 }
 0x3b8   : > { %2147 = vmatpush3.bf16.xpose.msra.mxu0 %v1019_v24 }
 0x3b9   : > { %v2664_v25 = vpack.c.bf16 %v2283_v19, %v2282_v23 }
 0x3ba   : > { %v1010_v26 = vpop.permute.xlu1 %1009 }
 0x3bb   : > { %1074 = vrot.lane.b32.xlu0 %v2664_v25, %s2392_s19  ;;  %2215 = vmatprep.subr.msk.bf16.mxu0 %vm1011_vm2, %v1010_v26  ;;  %v1022_v27 = vsel %vm1011_vm2, %v1010_v26, 0 }
 0x3c0   : > { %2149 = vmatpush3.bf16.xpose.msra.mxu0 %v1022_v27 }
 0x3c7   : > { %2151 = vmatmul.mubr.msk.bf16.vlgmr.msra.gmra.mrb[4].mxu0 %vm1011_vm2, %v2656_v14 }
 0x3c8   : > { %2158 = vmatprep.mubr.msk.bf16.mxu0 %vm1011_vm2, %v2664_v25 }
 0x426   : > { %v1077_v30 = vpop.permute.xlu1 %1076 }
 0x427   : > { %v1088_v31 = vsel %vm1011_vm2, %v1077_v30, 0 }
 0x42d   : > { %v1075_v28 = vpop.permute.xlu0 %1074 }
 0x42e   : > { %v1085_v29 = vsel %vm1011_vm2, %v1075_v28, 0  ;;  %2216 = vmatprep.subr.msk.bf16.mxu0 %vm1011_vm2, %v1075_v28 }
 0x42f   : > { %2155 = vmatpush3.bf16.xpose.msra.mxu0 %v1085_v29 }
 0x430   : > { %2217 = vmatprep.subr.msk.bf16.mxu0 %vm1011_vm2, %v1077_v30 }
 0x437   : > { %2157 = vmatpush3.bf16.xpose.msra.mxu0 %v1088_v31 }
 0x43e   : > { %2159 = vmatmul.mubr.msk.bf16.vlgmr.msra.gmra.mrb[8].mxu0 %vm1011_vm2, %v2659_v16 }
 0x49a   : > { %v2152_v32 = vpop.f32.mrb[4].mxu0 }
 0x49b   : > { %v1058_v33 = vpop.f32.mrb[5].mxu0  ;;  %v1140_v46 = vmul.f32 0.25, %v2152_v32 }
 0x49c   : > { %v2153_v34 = vpop.f32.mrb[6].mxu0  ;;  %v1138_v49 = vmul.f32 0.25, %v1058_v33 }
 0x49d   : > { %v1061_v35 = vpop.f32.mrb[7].mxu0  ;;  %v1150_v54 = vadd.f32 %v1147_v45, %v1140_v46 }
 0x49e   : > { %v1139_v55 = vmul.f32 0.25, %v1061_v35  ;;  %v1148_v57 = vadd.f32 %v1147_v45, %v1138_v49 }
 0x49f   : > { %v1161_v58 = vsel %vm1154_vm4, %v1150_v54, -inf }
 0x4a0   : > { %v1155_v59 = vsel %vm1154_vm4, %v1148_v57, -inf  ;;  %v1149_v60 = vadd.f32 %v1147_v45, %v1139_v55 }
 0x4a2   : > { %v1158_v61 = vsel %vm1154_vm4, %v1149_v60, -inf }
 0x511   : > { %v2160_v38 = vpop.f32.mrb[8].mxu0 }
 0x512   : > { %v1124_v39 = vpop.f32.mrb[9].mxu0  ;;  %v1143_v40 = vmul.f32 0.25, %v2160_v38 }
 0x513   : > { %v1141_v41 = vmul.f32 0.25, %v1124_v39  ;;  %v2161_v42 = vpop.f32.mrb[10].mxu0 }
 0x514   : > { %v1127_v43 = vpop.f32.mrb[11].mxu0  ;;  %v1153_v52 = vadd.f32 %v1147_v45, %v1143_v40 }
 0x515   : > { %v1142_v47 = vmul.f32 0.25, %v1127_v43  ;;  %v1151_v48 = vadd.f32 %v1147_v45, %v1141_v41 }
 0x516   : > { %v1170_v56 = vsel %vm1154_vm4, %v1153_v52, -inf }
 0x517   : > { %v1164_v50 = vsel %vm1154_vm4, %v1151_v48, -inf  ;;  %v1152_v51 = vadd.f32 %v1147_v45, %v1142_v47 }
 0x518   : > { %1165 = vmax.xlane.f32.xlu0 %v1164_v50 }
 0x519   : > { %v1167_v53 = vsel %vm1154_vm4, %v1152_v51, -inf }
 0x51a   : > { %1168 = vmax.xlane.f32.xlu1 %v1167_v53 }
 0x51c   : > { %1171 = vmax.xlane.f32.xlu0 %v1170_v56 }
 0x51e   : > { %1162 = vmax.xlane.f32.xlu1 %v1161_v58 }
 0x520   : > { %1156 = vmax.xlane.f32.xlu0 %v1155_v59  ;;  %v2291_v59 = vld [vmem:[%s2539_s30] sm:$0xff]  }
 0x524   : > { %1159 = vmax.xlane.f32.xlu0 %v1158_v61 }
 0x5a5   : > { %v1166_v62 = vpop.xlane.xlu0 %1165 }
 0x5a6   : > { %v1176_v0 = vsub.f32 %v1151_v48, %v1166_v62 }
 0x5a7   : > { %v1169_v63 = vpop.xlane.xlu1 %1168 }
 0x5a8   : > { %v1177_v1 = vsub.f32 %v1152_v51, %v1169_v63  ;;  %v1185_v5 = vmul.f32 1.442695, %v1176_v0 }
 0x5a9   : > { %v1172_v2 = vpop.xlane.xlu0 %1171 }
 0x5aa   : > { %v1187_v3 = vmul.f32 1.442695, %v1177_v1  ;;  %v1178_v4 = vsub.f32 %v1153_v52, %v1172_v2 }
 0x5ab   : > { %v1163_v18 = vpop.xlane.xlu1 %1162 }
 0x5ac   : > { %2309 = vpow2.f32 %v1187_v3  ;;  %v1189_v6 = vmul.f32 1.442695, %v1178_v4  ;;  %v1175_v23 = vsub.f32 %v1150_v54, %v1163_v18  ;;  %v2043_v18 = vld [vmem:[%s2870_s1] ss:$0 sm:$0xff] }
 0x5ad   : > { %v1157_v15 = vpop.xlane.xlu0 %1156 }
 0x5ae   : > { %2311 = vpow2.f32 %v1189_v6  ;;  %v1173_v17 = vsub.f32 %v1148_v57, %v1157_v15  ;;  %v1183_v27 = vmul.f32 1.442695, %v1175_v23 }
 0x5af   : > { %2313 = vpow2.f32 %v1185_v5 }
 0x5b0   : > { %v1179_v24 = vmul.f32 1.442695, %v1173_v17 }
 0x5b1   : > { %v1160_v19 = vpop.xlane.xlu0 %1159 }
 0x5b2   : > { %v1174_v26 = vsub.f32 %v1149_v60, %v1160_v19  ;;  %2315 = vpow2.f32 %v1179_v24  ;;  %v2292_v60 = vld [vmem:[%s2539_s30 + $0x8] sm:$0xff]  }
 0x5b3   : > { %2317 = vpow2.f32 %v1183_v27 }
 0x5b4   : > { %v1181_v28 = vmul.f32 1.442695, %v1174_v26 }
 0x5b6   : > { %v2310_v7 = vpop.eup %2309  ;;  %2319 = vpow2.f32 %v1181_v28 }
 0x5b7   : > { %v1203_v8 = vsel %vm1154_vm4, %v2310_v7, 0.0 }
 0x5b8   : > { %v2312_v9 = vpop.eup %2311  ;;  %1204 = vadd.xlane.f32.xlu1 %v1203_v8 }
 0x5b9   : > { %v1206_v10 = vsel %vm1154_vm4, %v2312_v9, 0.0  ;;  %v2314_v11 = vpop.eup %2313 }
 0x5ba   : > { %1207 = vadd.xlane.f32.xlu0 %v1206_v10  ;;  %v1200_v12 = vsel %vm1154_vm4, %v2314_v11, 0.0 }
 0x5bc   : > { %v2316_v29 = vpop.eup %2315 }
 0x5bd   : > { %v1191_v30 = vsel %vm1154_vm4, %v2316_v29, 0.0  ;;  %v2318_v31 = vpop.eup %2317 }
 0x5be   : > { %1201 = vadd.xlane.f32.xlu0 %v1200_v12  ;;  %v1197_v32 = vsel %vm1154_vm4, %v2318_v31, 0.0 }
 0x5c9   : > { %1288 = vrot.lane.b32.xlu1 %v2664_v25, %s2394_s11  ;;  %v2320_v25 = vpop.eup %2319 }
 0x5d4   : > { %1290 = vrot.lane.b32.xlu0 %v2659_v16, %s2394_s11  ;;  %v1194_v16 = vsel %vm1154_vm4, %v2320_v25, 0.0 }
 0x5ed   : > { %1192 = vadd.xlane.f32.xlu1 %v1191_v30 }
 0x5f1   : > { %1198 = vadd.xlane.f32.xlu1 %v1197_v32 }
 0x5f3   : > { %1195 = vadd.xlane.f32.xlu0 %v1194_v16 }
 0x602   : > { %1227 = vrot.lane.b32.xlu1 %v2656_v14, %s2394_s11 }
 0x609   : > { %1225 = vrot.lane.b32.xlu0 %v2651_v13, %s2394_s11 }
 0x645   : > { %v1205_v33 = vpop.xlane.xlu1 %1204 }
 0x647   : > { %v1208_v34 = vpop.xlane.xlu0 %1207 }
 0x648   : > { %2321 = vrcp.f32 %v1208_v34 }
 0x649   : > { %v1289_v35 = vpop.permute.xlu1 %1288  ;;  %2323 = vrcp.f32 %v1205_v33 }
 0x64a   : > { %2170 = vmatprep.subr.bf16.mxu0 %v1289_v35 }
 0x64b   : > { %v1202_v36 = vpop.xlane.xlu0 %1201  ;;  %2171 = vmatpush3.bf16.msra.mxu0 %v1289_v35 }
 0x64c   : > { %2325 = vrcp.f32 %v1202_v36 }
 0x64f   : > { %v1291_v37 = vpop.permute.xlu0 %1290 }
 0x650   : > { %v1300_v38 = vsel %vm1236_vm5, %v1291_v37, 0  ;;  %2219 = vmatprep.subr.msk.bf16.mxu0 %vm1236_vm5, %v1291_v37 }
 0x651   : > { %2173 = vmatpush3.bf16.msra.mxu0 %v1300_v38 }
 0x652   : > { %v2322_v39 = vpop.eup %2321 }
 0x653   : > { %v2324_v14 = vpop.eup %2323  ;;  %v1220_v13 = vmul.f32 %v2322_v39, %v2312_v9 }
 0x654   : > { %v1219_v42 = vmul.f32 %v2324_v14, %v2310_v7 }
 0x655   : > { %v1224_v44 = vpack.c.bf16 %v1220_v13, %v1220_v13 }
 0x656   : > { %v2326_v40 = vpop.eup %2325 }
 0x657   : > { %v1218_v41 = vmul.f32 %v2326_v40, %v2314_v11 }
 0x659   : > { %v1223_v43 = vpack.c.bf16 %v1219_v42, %v1218_v41 }
 0x65b   : > { %2174 = vmatprep.mubr.msk.bf16.mxu0 %vm1154_vm4, %v1223_v43 }
 0x65c   : > { %2175 = vmatmul.mubr.msk.bf16.vlgmr.msra.gmra.mrb[12].mxu0 %vm1154_vm4, %v1224_v44  ;;  %v2293_v44 = vld [vmem:[%s2556_s18] sm:$0xff]  }
 0x65d   : > { %2186 = vmatprep.subr.bf16.mxu0 %v2293_v44 }
 0x65e   : > { %2187 = vmatpush3.bf16.msra.mxu0 %v2293_v44 }
 0x67a   : > { %v1193_v45 = vpop.xlane.xlu1 %1192 }
 0x67b   : > { %2327 = vrcp.f32 %v1193_v45  ;;  %v2294_v45 = vld [vmem:[%s2556_s18 + $0x8] sm:$0xff]  }
 0x67c   : > { %2188 = vmatprep.subr.bf16.mxu0 %v2294_v45 }
 0x67d   : > { %2189 = vmatpush3.bf16.msra.mxu0 %v2294_v45 }
 0x67e   : > { %v1199_v46 = vpop.xlane.xlu1 %1198 }
 0x67f   : > { %2329 = vrcp.f32 %v1199_v46 }
 0x680   : > { %v1196_v47 = vpop.xlane.xlu0 %1195 }
 0x681   : > { %2331 = vrcp.f32 %v1196_v47 }
 0x682   : > { %v1228_v49 = vpop.permute.xlu1 %1227 }
 0x683   : > { %v1238_v52 = vsel %vm1236_vm5, %v1228_v49, 0 }
 0x684   : > { %v1226_v48 = vpop.permute.xlu0 %1225 }
 0x685   : > { %2162 = vmatprep.subr.bf16.mxu1 %v1226_v48  ;;  %v2328_v50 = vpop.eup %2327 }
 0x686   : > { %2163 = vmatpush3.bf16.msra.mxu1 %v1226_v48  ;;  %v1215_v55 = vmul.f32 %v2328_v50, %v2316_v29 }
 0x687   : > { %2218 = vmatprep.subr.msk.bf16.mxu1 %vm1236_vm5, %v1228_v49 }
 0x689   : > { %v2330_v51 = vpop.eup %2329 }
 0x68a   : > { %2165 = vmatpush3.bf16.msra.mxu1 %v1238_v52  ;;  %v1217_v54 = vmul.f32 %v2330_v51, %v2318_v31 }
 0x68b   : > { %v2332_v53 = vpop.eup %2331  ;;  %2178 = vmatprep.subr.bf16.mxu1 %v2291_v59 }
 0x68c   : > { %v1216_v56 = vmul.f32 %v2332_v53, %v2320_v25  ;;  %v1222_v58 = vpack.c.bf16 %v1217_v54, %v1217_v54 }
 0x68e   : > { %v1221_v57 = vpack.c.bf16 %v1216_v56, %v1215_v55 }
 0x690   : > { %2166 = vmatprep.mubr.msk.bf16.mxu1 %vm1154_vm4, %v1221_v57  ;;  %v2048_v57 = vld [vmem:[%s2871_s22] ss:$0 sm:$0xff] }
 0x691   : > { %2167 = vmatmul.mubr.msk.bf16.vlgmr.msra.gmra.mrb[0].mxu1 %vm1154_vm4, %v1222_v58 }
 0x692   : > { %2179 = vmatpush3.bf16.msra.mxu1 %v2291_v59 }
 0x693   : > { %2180 = vmatprep.subr.bf16.mxu1 %v2292_v60 }
 0x696   : > { %2181 = vmatpush3.bf16.msra.mxu1 %v2292_v60 }
 0x72f   : > { %v2176_v61 = vpop.f32.mrb[12].mxu0 }
 0x730   : > { %v1336_v62 = vpop.f32.mrb[13].mxu0 }
 0x731   : > { %v2177_v63 = vpop.f32.mrb[14].mxu0 }
 0x732   : > { %v1339_v0 = vpop.f32.mrb[15].mxu0 }
 0x733   : > { %v2284_v1 = vpack.i.bf16 %v1339_v0, %v1336_v62  ;;  %v2049_v0 = vld [vmem:[%s2873_s29] ss:$0 sm:$0xff] }
 0x735   : > { %2285 = vrot.lane.b32.xlu1 %v2284_v1, %s2395_s26 }
 0x739   : > { %1357 = vrot.lane.b32.xlu1 %v2176_v61, %s2395_s26 }
 0x764   : > { %v2168_v2 = vpop.f32.mrb[0].mxu1 }
 0x765   : > { %v1274_v3 = vpop.f32.mrb[1].mxu1 }
 0x766   : > { %v2169_v4 = vpop.f32.mrb[2].mxu1 }
 0x767   : > { %v1277_v5 = vpop.f32.mrb[3].mxu1 }
 0x7a7   : > { %v2286_v6 = vpop.permute.xlu1 %2285 }
 0x7a8   : > { %v2288_v7 = vunpack.i.h.bf16 %v2286_v6  ;;  %v2287_v8 = vunpack.i.l.bf16 %v2286_v6 }
 0x7aa   : > { %v1363_v9 = vsel %vm1011_vm2, %v1277_v5, %v2288_v7  ;;  %v1362_v10 = vsel %vm1011_vm2, %v1274_v3, %v2287_v8  ;;  %v2295_v7 = vld [vmem:[%s2570_s0] sm:$0xff]   ;;  %v2296_v8 = vld [vmem:[%s2570_s0 + $0x8] sm:$0xff]  }
 0x7ab   : > { %v1365_v11 = vpack.c.bf16 %v1363_v9, %v1362_v10  ;;  %v1358_v12 = vpop.permute.xlu1 %1357  ;;  %2194 = vmatprep.subr.bf16.mxu1 %v2295_v7  ;;  %v2297_v9 = vld [vmem:[%s2570_s0 + $0x10] sm:$0xff]   ;;  %v2298_v10 = vld [vmem:[%s2570_s0 + $0x18] sm:$0xff]  }
 0x7ac   : > { %v1364_v15 = vsel %vm1011_vm2, %v2168_v2, %v1358_v12  ;;  %v2300_v12 = vld [vmem:[%s2570_s0 + $0x28] sm:$0xff]  }
 0x7ad   : > { %v1366_v17 = vpack.c.bf16 %v1364_v15, %v1364_v15  ;;  %2182 = vmatprep.mubr.msk.bf16.mxu1 %vm851_vm1, %v1365_v11  ;;  %v2299_v11 = vld [vmem:[%s2570_s0 + $0x20] sm:$0xff]   ;;  %v2301_v15 = vld [vmem:[%s2570_s0 + $0x30] sm:$0xff]  }
 0x7af   : > { %2183 = vmatmul.mubr.msk.bf16.vlgmr.msra.gmra.mrb[4].mxu1 %vm851_vm1, %v1366_v17  ;;  %v2302_v17 = vld [vmem:[%s2570_s0 + $0x38] sm:$0xff]  }
 0x7b0   : > { %2195 = vmatpush3.bf16.msra.mxu1 %v2295_v7 }
 0x7b1   : > { %2196 = vmatprep.subr.bf16.mxu1 %v2296_v8 }
 0x7b4   : > { %2197 = vmatpush3.bf16.msra.mxu1 %v2296_v8 }
 0x7b5   : > { %2198 = vmatprep.subr.bf16.mxu1 %v2297_v9 }
 0x7b8   : > { %2199 = vmatpush3.bf16.msra.mxu1 %v2297_v9 }
 0x7b9   : > { %2200 = vmatprep.subr.bf16.mxu1 %v2298_v10 }
 0x7bc   : > { %2201 = vmatpush3.bf16.msra.mxu1 %v2298_v10 }
 0x7bd   : > { %2202 = vmatprep.subr.bf16.mxu1 %v2299_v11 }
 0x7c0   : > { %2203 = vmatpush3.bf16.msra.mxu1 %v2299_v11 }
 0x7c1   : > { %2204 = vmatprep.subr.bf16.mxu1 %v2300_v12 }
 0x7c4   : > { %2205 = vmatpush3.bf16.msra.mxu1 %v2300_v12 }
 0x7c5   : > { %2206 = vmatprep.subr.bf16.mxu1 %v2301_v15 }
 0x7c8   : > { %2207 = vmatpush3.bf16.msra.mxu1 %v2301_v15 }
 0x7c9   : > { %2208 = vmatprep.subr.bf16.mxu1 %v2302_v17 }
 0x7cc   : > { %2209 = vmatpush3.bf16.msra.mxu1 %v2302_v17 }
 0x882   : > { %v2184_v19 = vpop.f32.mrb[4].mxu1 }
 0x883   : > { %v1430_v23 = vpop.f32.mrb[5].mxu1  ;;  %v1439_v24 = vadd.f32 %v2184_v19, %v2043_v18 }
 0x884   : > { %v1431_v26 = vadd.f32 %v2043_v18, %v1430_v23  ;;  %v2185_v27 = vpop.f32.mrb[6].mxu1 }
 0x885   : > { %v1433_v28 = vpop.f32.mrb[7].mxu1  ;;  %v2719_v31 = vadd.f32 %v1439_v24, %v2616_v21 }
 0x886   : > { %v2716_v29 = vadd.f32 %v1431_v26, %v2614_v20  ;;  %v1434_v30 = vadd.f32 %v2043_v18, %v1433_v28  ;;  %v2050_v18 = vld [vmem:[%s691_s27] ss:$0 sm:$0xff] }
 0x887   : > { %v1455_v33 = vsel %vm851_vm1, %v2719_v31, 0.0 }
 0x888   : > { %v2722_v25 = vadd.f32 %v1434_v30, %v2618_v22  ;;  %v1449_v32 = vsel %vm851_vm1, %v2716_v29, 0.0 }
 0x889   : > { %1450 = vadd.xlane.f32.xlu0 %v1449_v32 }
 0x88a   : > { %v1452_v16 = vsel %vm851_vm1, %v2722_v25, 0.0 }
 0x88b   : > { %1453 = vadd.xlane.f32.xlu1 %v1452_v16 }
 0x88d   : > { %1456 = vadd.xlane.f32.xlu0 %v1455_v33 }
 0x916   : > { %v1451_v20 = vpop.xlane.xlu0 %1450 }
 0x917   : > { %v1458_v34 = vmul.f32 0.03125, %v1451_v20 }
 0x918   : > { %v1454_v35 = vpop.xlane.xlu1 %1453 }
 0x919   : > { %v1461_v21 = vsub.f32 %v2716_v29, %v1458_v34  ;;  %v1459_v22 = vmul.f32 0.03125, %v1454_v35 }
 0x91a   : > { %v1457_v36 = vpop.xlane.xlu0 %1456 }
 0x91b   : > { %v1462_v37 = vsub.f32 %v2722_v25, %v1459_v22  ;;  %v1460_v38 = vmul.f32 0.03125, %v1457_v36  ;;  %v1464_v39 = vmul.f32 %v1461_v21, %v1461_v21 }
 0x91d   : > { %v1463_v14 = vsub.f32 %v2719_v31, %v1460_v38  ;;  %v1467_v40 = vsel %vm851_vm1, %v1464_v39, 0.0  ;;  %v1465_v13 = vmul.f32 %v1462_v37, %v1462_v37 }
 0x91e   : > { %1468 = vadd.xlane.f32.xlu0 %v1467_v40 }
 0x91f   : > { %v1466_v41 = vmul.f32 %v1463_v14, %v1463_v14  ;;  %v1470_v42 = vsel %vm851_vm1, %v1465_v13, 0.0 }
 0x921   : > { %v1473_v43 = vsel %vm851_vm1, %v1466_v41, 0.0 }
 0x922   : > { %1471 = vadd.xlane.f32.xlu0 %v1470_v42  ;;  %1474 = vadd.xlane.f32.xlu1 %v1473_v43 }
 0x9ab   : > { %v1469_v46 = vpop.xlane.xlu0 %1468 }
 0x9ac   : > { %v1476_v47 = vmul.f32 0.03125, %v1469_v46 }
 0x9ae   : > { %v1479_v48 = vadd.f32 1e-06, %v1476_v47 }
 0x9af   : > { %v1475_v49 = vpop.xlane.xlu1 %1474  ;;  %v1472_v50 = vpop.xlane.xlu0 %1471 }
 0x9b0   : > { %2333 = vrsqrt.f32 %v1479_v48  ;;  %v1478_v51 = vmul.f32 0.03125, %v1475_v49  ;;  %v1477_v52 = vmul.f32 0.03125, %v1472_v50 }
 0x9b2   : > { %v1481_v53 = vadd.f32 1e-06, %v1478_v51  ;;  %v1480_v54 = vadd.f32 1e-06, %v1477_v52 }
 0x9b4   : > { %2335 = vrsqrt.f32 %v1481_v53 }
 0x9b5   : > { %2337 = vrsqrt.f32 %v1480_v54 }
 0x9ba   : > { %v2334_v55 = vpop.eup %2333 }
 0x9bb   : > { %v1485_v56 = vmul.f32 %v2334_v55, %v1461_v21 }
 0x9bd   : > { %v1494_v62 = vmul.f32 %v2048_v57, %v1485_v56 }
 0x9be   : > { %v2336_v58 = vpop.eup %2335 }
 0x9bf   : > { %v2338_v59 = vpop.eup %2337  ;;  %v1487_v60 = vmul.f32 %v2336_v58, %v1463_v14  ;;  %v1503_v3 = vadd.f32 %v2049_v0, %v1494_v62 }
 0x9c0   : > { %v1486_v61 = vmul.f32 %v2338_v59, %v1462_v37 }
 0x9c1   : > { %v1496_v63 = vmul.f32 %v2048_v57, %v1487_v60 }
 0x9c2   : > { %v1495_v1 = vmul.f32 %v2048_v57, %v1486_v61 }
 0x9c3   : > { %v1505_v2 = vadd.f32 %v2049_v0, %v1496_v63 }
 0x9c4   : > { %v1504_v4 = vadd.f32 %v2049_v0, %v1495_v1 }
 0x9c5   : > { %v1507_v5 = vpack.c.bf16 %v1505_v2, %v1505_v2 }
 0x9c6   : > { %v1506_v6 = vpack.c.bf16 %v1504_v4, %v1503_v3 }
 0x9c8   : > { %2190 = vmatprep.mubr.msk.bf16.mxu0 %vm851_vm1, %v1506_v6 }
 0x9c9   : > { %2191 = vmatmul.mubr.msk.bf16.vlgmr.msra.gmra.mrb[16].mxu0 %vm851_vm1, %v1507_v5 }
 0xa9c   : > { %v2192_v19 = vpop.f32.mrb[16].mxu0 }
 0xa9d   : > { %v2763_v23 = vadd.f32 %v2192_v19, %v2050_v18  ;;  %v1571_v24 = vpop.f32.mrb[17].mxu0 }
 0xa9e   : > { %v2765_v26 = vadd.f32 %v2050_v18, %v1571_v24  ;;  %v2193_v27 = vpop.f32.mrb[18].mxu0 }
 0xa9f   : > { %v2768_v28 = vmul.f32 0.70710677, %v2763_v23  ;;  %v1574_v30 = vpop.f32.mrb[19].mxu0 }
 0xaa0   : > { %v2771_v32 = vmul.f32 0.70710677, %v2765_v26  ;;  %v2773_v16 = vadd.f32 %v2050_v18, %v1574_v30  ;;  %v2396_v30 = vmov -1.0  }
 0xaa1   : > { %v1599_v33 = vand.u32 2147483647, %v2768_v28  ;;  %vm1593_vm6 = vcmp.ge.f32.partialorder %v2768_v28, 0.0 }
 0xaa2   : > { %v1597_v20 = vand.u32 2147483647, %v2771_v32  ;;  %v2778_v35 = vmul.f32 0.70710677, %v2773_v16  ;;  %vm1591_vm7 = vcmp.ge.f32.partialorder %v2771_v32, 0.0  ;;  %v1587_v32 = vmul.f32 0.5, %v2763_v23 }
 0xaa3   : > { %v1602_v34 = vmul.f32 0.3275911, %v1599_v33  ;;  %v1641_v14 = vsub.f32 0.0, %v1599_v33 }
 0xaa4   : > { %v1600_v21 = vmul.f32 0.3275911, %v1597_v20  ;;  %v1598_v36 = vand.u32 2147483647, %v2778_v35  ;;  %v1639_v40 = vsub.f32 0.0, %v1597_v20  ;;  %vm1592_vm8 = vcmp.ge.f32.partialorder %v2778_v35, 0.0 }
 0xaa5   : > { %v1605_v22 = vadd.f32 1.0, %v1602_v34  ;;  %v1644_v41 = vmul.f32 %v1641_v14, %v1599_v33  ;;  %v1596_v33 = vsel %vm1593_vm6, 1.0, %v2396_v30 }
 0xaa6   : > { %v1603_v37 = vadd.f32 1.0, %v1600_v21  ;;  %v1601_v38 = vmul.f32 0.3275911, %v1598_v36  ;;  %v1640_v42 = vsub.f32 0.0, %v1598_v36  ;;  %v1642_v45 = vmul.f32 %v1639_v40, %v1597_v20 }
 0xaa7   : > { %2339 = vrcp.f32 %v1605_v22  ;;  %v1649_v49 = vmul.f32 1.442695, %v1644_v41  ;;  %v1594_v21 = vsel %vm1591_vm7, 1.0, %v2396_v30  ;;  %v1585_v40 = vmul.f32 0.5, %v2765_v26 }
 0xaa8   : > { %2341 = vrcp.f32 %v1603_v37  ;;  %v1604_v39 = vadd.f32 1.0, %v1601_v38  ;;  %v1643_v51 = vmul.f32 %v1640_v42, %v1598_v36  ;;  %v1645_v53 = vmul.f32 1.442695, %v1642_v45 }
 0xaa9   : > { %v1595_v38 = vsel %vm1592_vm8, 1.0, %v2396_v30 }
 0xaaa   : > { %2343 = vrcp.f32 %v1604_v39  ;;  %v1647_v59 = vmul.f32 1.442695, %v1643_v51 }
 0xaab   : > { %2345 = vpow2.f32 %v1649_v49 }
 0xaac   : > { %2347 = vpow2.f32 %v1645_v53 }
 0xaad   : > { %2349 = vpow2.f32 %v1647_v59 }
 0xab1   : > { %v2340_v13 = vpop.eup %2339 }
 0xab2   : > { %v2342_v43 = vpop.eup %2341  ;;  %v1614_v44 = vmul.f32 1.0614054, %v2340_v13 }
 0xab3   : > { %v1612_v46 = vmul.f32 1.0614054, %v2342_v43 }
 0xab4   : > { %v1617_v47 = vadd.f32 -1.4531521, %v1614_v44  ;;  %v2344_v48 = vpop.eup %2343 }
 0xab5   : > { %v1615_v50 = vadd.f32 -1.4531521, %v1612_v46  ;;  %v1613_v54 = vmul.f32 1.0614054, %v2344_v48  ;;  %v2346_v10 = vpop.eup %2345  ;;  %v2055_v46 = vld [vmem:[%s699_s23] ss:$0 sm:$0xff] }
 0xab6   : > { %v1620_v52 = vmul.f32 %v2340_v13, %v1617_v47  ;;  %v2348_v12 = vpop.eup %2347 }
 0xab7   : > { %v1618_v55 = vmul.f32 %v2342_v43, %v1615_v50  ;;  %v1616_v57 = vadd.f32 -1.4531521, %v1613_v54  ;;  %v2350_v27 = vpop.eup %2349 }
 0xab8   : > { %v1623_v56 = vadd.f32 1.4214138, %v1620_v52 }
 0xab9   : > { %v1621_v58 = vadd.f32 1.4214138, %v1618_v55  ;;  %v1619_v61 = vmul.f32 %v2344_v48, %v1616_v57 }
 0xaba   : > { %v1626_v60 = vmul.f32 %v2340_v13, %v1623_v56 }
 0xabb   : > { %v1624_v62 = vmul.f32 %v2342_v43, %v1621_v58  ;;  %v1622_v0 = vadd.f32 1.4214138, %v1619_v61 }
 0xabc   : > { %v1629_v63 = vadd.f32 -0.28449672, %v1626_v60 }
 0xabd   : > { %v1627_v1 = vadd.f32 -0.28449672, %v1624_v62  ;;  %v1625_v3 = vmul.f32 %v2344_v48, %v1622_v0 }
 0xabe   : > { %v1632_v2 = vmul.f32 %v2340_v13, %v1629_v63 }
 0xabf   : > { %v1630_v4 = vmul.f32 %v2342_v43, %v1627_v1  ;;  %v1628_v6 = vadd.f32 -0.28449672, %v1625_v3 }
 0xac0   : > { %v1635_v5 = vadd.f32 0.2548296, %v1632_v2 }
 0xac1   : > { %v1633_v7 = vadd.f32 0.2548296, %v1630_v4  ;;  %v1631_v9 = vmul.f32 %v2344_v48, %v1628_v6 }
 0xac2   : > { %v1638_v8 = vmul.f32 %v2340_v13, %v1635_v5  ;;  %v1586_v13 = vmul.f32 0.5, %v2773_v16 }
 0xac3   : > { %v1636_v11 = vmul.f32 %v2342_v43, %v1633_v7  ;;  %v1634_v17 = vadd.f32 0.2548296, %v1631_v9 }
 0xac4   : > { %v1653_v15 = vmul.f32 %v2346_v10, %v1638_v8 }
 0xac5   : > { %v1651_v18 = vmul.f32 %v2348_v12, %v1636_v11  ;;  %v1637_v24 = vmul.f32 %v2344_v48, %v1634_v17 }
 0xac6   : > { %v1656_v19 = vsub.f32 1.0, %v1653_v15 }
 0xac7   : > { %v1654_v20 = vsub.f32 1.0, %v1651_v18  ;;  %v1652_v22 = vmul.f32 %v2350_v27, %v1637_v24 }
 0xac8   : > { %v1659_v34 = vmul.f32 %v1656_v19, %v1596_v33 }
 0xac9   : > { %v1657_v36 = vmul.f32 %v1654_v20, %v1594_v21  ;;  %v1655_v37 = vsub.f32 1.0, %v1652_v22 }
 0xaca   : > { %v1662_v28 = vadd.f32 1.0, %v1659_v34 }
 0xacb   : > { %v1660_v39 = vadd.f32 1.0, %v1657_v36  ;;  %v1658_v14 = vmul.f32 %v1655_v37, %v1595_v38 }
 0xacc   : > { %v1665_v42 = vmul.f32 %v1662_v28, %v1587_v32 }
 0xacd   : > { %v1661_v41 = vadd.f32 1.0, %v1658_v14  ;;  %v1663_v43 = vmul.f32 %v1660_v39, %v1585_v40 }
 0xace   : > { %v1667_v45 = vpack.c.bf16 %v1665_v42, %v1665_v42 }
 0xacf   : > { %v1664_v44 = vmul.f32 %v1661_v41, %v1586_v13 }
 0xad1   : > { %v1666_v35 = vpack.c.bf16 %v1664_v44, %v1663_v43 }
 0xad3   : > { %2210 = vmatprep.mubr.bf16.mxu1 %v1666_v35 }
 0xad4   : > { %2211 = vmatmul.mubr.bf16.vlgmr.msra.gmra.mrb[8].mxu1 %v1667_v45 }
 0xba7   : > { %v2212_v23 = vpop.f32.mrb[8].mxu1 }
 0xba8   : > { %v1782_v26 = vadd.f32 %v2212_v23, %v2055_v46  ;;  %v1773_v47 = vpop.f32.mrb[9].mxu1 }
 0xba9   : > { %v1774_v16 = vadd.f32 %v2055_v46, %v1773_v47  ;;  %v2213_v48 = vpop.f32.mrb[10].mxu1 }
 0xbaa   : > { %v1789_v49 = vadd.f32 %v1782_v26, %v2719_v31  ;;  %v1776_v50 = vpop.f32.mrb[11].mxu1 }
 0xbab   : > { %v1787_v51 = vadd.f32 %v1774_v16, %v2716_v29  ;;  %v1777_v52 = vadd.f32 %v2055_v46, %v1776_v50 }
 0xbac   : > { %1792 = vst.msk [vmem:[#allocation2 + $0x10] sm:$0xff] %vm851_vm1, %v1789_v49  ;;  %1795 = vst.msk [vmem:[%s2576_s10 + $0x10] sm:$0xff] %vm851_vm1, %v1789_v49 }
 0xbad   : > { %1790 = vst.msk [vmem:[#allocation2] sm:$0xff] %vm851_vm1, %v1787_v51  ;;  %1793 = vst.msk [vmem:[%s2576_s10] sm:$0xff] %vm851_vm1, %v1787_v51  ;;  %v1788_v53 = vadd.f32 %v1777_v52, %v2722_v25 }
 0xbaf   : > { %1791 = vst.msk [vmem:[#allocation2 + $0x8] sm:$0xff] %vm851_vm1, %v1788_v53  ;;  %1794 = vst.msk [vmem:[%s2576_s10 + $0x8] sm:$0xff] %vm851_vm1, %v1788_v53 }
 0xbb0 PF: > { %s2874_s25 = sld [smem:[#allocation6_spill]]  ;;  %s2875_s18 = sld [smem:[#allocation4_spill]] }
 0xbb1   : > { %s2876_s19 = sld [smem:[#allocation5_spill]]  ;;  %s2877_s20 = sld [smem:[#allocation7_spill]] }
 0xbb2   : > { %s2878_s21 = sld [smem:[#allocation8_spill]] }
 0xbb6   : > { %s25_s22 = sadd.s32 1, %s2874_s25  }
 0xbb7   : > { %p22_p8 = scmp.ge.s32.totalorder %s25_s22, 10  }
 0xbb9   :  { %24 = sbr.rel (!%p22_p8) target bundleno = 10 (0xa), region = 150 }

</bundles_post_ra>
